<compile_context>
chip_gen: v5e
topology: v5e:2x2
jax: 0.10.0
libtpu: 0.0.40
codegen_flags: <defaults>
</compile_context>

<pallas_src>
from functools import partial

import jax
import jax.numpy as jnp
from jax.experimental import pallas as pl
from jax.experimental.pallas import tpu as pltpu

LRELU_SLOPE = 0.2
IN_EPS = 1e-5          # PyTorch InstanceNorm2d default eps
_LANE = 128            # target lane width for batch folding


# ----------------------------- kernel helpers -------------------------------

def _lrelu(x):
    return jnp.where(x > 0, x, LRELU_SLOPE * x)


def _instnorm_affine_dense(y, gamma, beta):
    """InstanceNorm(affine) when the whole lane axis is one sample's spatial map.
    Fused single pass: sum and sum-of-squares together, var = E[y^2] - mean^2."""
    m = jnp.mean(y, axis=-1, keepdims=True)
    m2 = jnp.mean(y * y, axis=-1, keepdims=True)
    scale = gamma * jax.lax.rsqrt(m2 - m * m + IN_EPS)
    return y * scale + (beta - m * scale)


def _instnorm_affine_seg(y, gamma, beta, avg):
    """Segmented InstanceNorm: the lane axis packs g samples x P spatial positions.
    `avg` is the (L, L) block-diagonal per-sample averaging matrix (1/P inside a
    sample, 0 across samples), so statistics never mix batch elements.  The two
    reductions are one MXU matmul each; everything stays f32 and lane-dense."""
    m = jnp.dot(y, avg, preferred_element_type=jnp.float32)        # per-lane mean
    m2 = jnp.dot(y * y, avg, preferred_element_type=jnp.float32)   # per-lane E[y^2]
    scale = gamma * jax.lax.rsqrt(m2 - m * m + IN_EPS)
    return y * scale + (beta - m * scale)


# ------------------------------ Pallas kernels ------------------------------

def _conv_bias_lrelu_kernel(p_ref, w_ref, b_ref, o_ref):
    # layer 1: conv (bf16 MXU, f32 acc) + bias + LeakyReLU(0.2)
    y = jnp.dot(w_ref[...], p_ref[...], preferred_element_type=jnp.float32)
    o_ref[...] = _lrelu(y + b_ref[...]).astype(o_ref.dtype)


def _conv_in_lrelu_kernel(p_ref, w_ref, gam_ref, bet_ref, o_ref):
    # conv (no bias) + InstanceNorm(affine) + LeakyReLU; one sample per grid step
    y = jnp.dot(w_ref[...], p_ref[...], preferred_element_type=jnp.float32)
    o_ref[...] = _lrelu(
        _instnorm_affine_dense(y, gam_ref[...], bet_ref[...])).astype(o_ref.dtype)


def _conv_in_lrelu_seg_kernel(p_ref, w_ref, gam_ref, bet_ref, avg_ref, o_ref):
    # conv + segmented InstanceNorm + LeakyReLU; g samples folded into the lanes
    y = jnp.dot(w_ref[...], p_ref[...], preferred_element_type=jnp.float32)
    o_ref[...] = _lrelu(
        _instnorm_affine_seg(y, gam_ref[...], bet_ref[...], avg_ref[...])
    ).astype(o_ref.dtype)


def _conv_in_lrelu_head_kernel(p_ref, w_ref, gam_ref, bet_ref, avg_ref, sel_ref,
                               w5_ref, b5_ref, o_ref):
    # layer 4 (conv + segmented IN + LeakyReLU) with the layer-5 conv fused in:
    # the final k4/p0 conv on the 4x4 map is a per-sample dot with w5 (+ b5).
    y = jnp.dot(w_ref[...], p_ref[...], preferred_element_type=jnp.float32)
    a = _lrelu(_instnorm_affine_seg(y, gam_ref[...], bet_ref[...], avg_ref[...]))
    row = jnp.sum(a * w5_ref[...], axis=0, keepdims=True)          # (1, L) VPU+reduce
    o_ref[...] = (jnp.dot(row, sel_ref[...],
                          preferred_element_type=jnp.float32) + b5_ref[...])  # (1, g)


# ------------------------------ pallas_call glue ----------------------------

def _run_layer(kernel, patches, w, extras, out_rows, out_dtype,
               block_lanes, out_block_lanes):
    """Run one layer over a 1-D 'parallel' grid of lane-blocks.

    patches: (K, L) bf16 with L = N*P (batch folded into the lane axis)
    w:       (C_out, K) bf16
    extras:  grid-invariant 2-D operands (per-channel columns, avg/sel mats, ...)
    """
    K, L = patches.shape
    C = w.shape[0]
    steps = L // block_lanes
    in_specs = [pl.BlockSpec((K, block_lanes), lambda n: (0, n)),
                pl.BlockSpec((C, K), lambda n: (0, 0))]
    in_specs += [pl.BlockSpec(tuple(e.shape), lambda n: (0, 0)) for e in extras]
    return pl.pallas_call(
        kernel,
        out_shape=jax.ShapeDtypeStruct((out_rows, steps * out_block_lanes),
                                       out_dtype),
        grid=(steps,),
        in_specs=in_specs,
        out_specs=pl.BlockSpec((out_rows, out_block_lanes), lambda n: (0, n)),
        compiler_params=pltpu.CompilerParams(
            dimension_semantics=("parallel",)),      # v7x: shard steps over 2 TCs
    )(patches, w, *extras)


def _fold_group(n, p):
    """Largest divisor g of the batch with g*P <= 128 lanes (lane-dense folding)."""
    g = 1
    for d in range(1, n + 1):
        if n % d == 0 and d * p <= _LANE:
            g = d
    return g


def _segment_avg(g, p, dtype=jnp.float32):
    """(L, L) block-diagonal per-sample averaging matrix, L = g*p."""
    lane = jnp.arange(g * p) // p
    return (lane[:, None] == lane[None, :]).astype(dtype) / p


def _segment_sel(g, p, dtype=jnp.float32):
    """(L, g) one-hot sample-selector (per-sample lane sums via one matmul)."""
    lane = jnp.arange(g * p) // p
    return (lane[:, None] == jnp.arange(g)[None, :]).astype(dtype)


def _im2col_folded(x_nchw, k, stride, pad):
    """NCHW -> (K, N*P) bf16 patches, K = C*k*k in (c, kh, kw) order, P = Ho*Wo.

    Pure XLA glue (pad + strided slices + reshape); patches are bf16 so the
    kernel-facing DMA bytes are halved.  TODO(synk): move this into the kernels
    (tap-wise accumulation on a VMEM-resident activation) to kill the blow-up.
    """
    N, C, H, W = x_nchw.shape
    xp = jnp.pad(x_nchw, ((0, 0), (0, 0), (pad, pad), (pad, pad)))
    Ho = (H + 2 * pad - k) // stride + 1
    Wo = (W + 2 * pad - k) // stride + 1
    cols = []
    for i in range(k):
        for j in range(k):
            cols.append(xp[:, :, i:i + stride * Ho:stride,
                              j:j + stride * Wo:stride])
    p = jnp.stack(cols, axis=2)                       # (N, C, k*k, Ho, Wo)
    p = p.reshape(N, C * k * k, Ho * Wo)              # (N, K, P)
    p = jnp.transpose(p, (1, 0, 2)).reshape(C * k * k, N * Ho * Wo)  # (K, N*P)
    return p.astype(jnp.bfloat16), Ho, Wo


def _unfold(out_cl, n, ho, wo):
    """(C, N*P) kernel output -> (N, C, Ho, Wo) for the next layer's im2col."""
    c = out_cl.shape[0]
    return out_cl.reshape(c, n, ho, wo).transpose(1, 0, 2, 3)


# ------------------------------- forward pass -------------------------------

@partial(jax.jit, static_argnums=(3,))
def discriminator_forward(params, x, labels, img_size):
    N = x.shape[0]
    # embedding lookup + concat as extra channel (glue), then bf16 activations
    emb = jnp.take(params["embed"], labels, axis=0)
    emb = emb.reshape(N, 1, img_size, img_size)
    h = jnp.concatenate([x, emb], axis=1).astype(jnp.bfloat16)

    # Layer 1: Conv(C+1 -> fd, k4 s2 p1) + bias + LeakyReLU
    p, Ho, Wo = _im2col_folded(h, 4, 2, 1)
    P = Ho * Wo
    g = _fold_group(N, P)
    out = _run_layer(_conv_bias_lrelu_kernel, p, params["w1m"], [params["b1v"]],
                     out_rows=params["w1m"].shape[0], out_dtype=jnp.bfloat16,
                     block_lanes=g * P, out_block_lanes=g * P)
    h = _unfold(out, N, Ho, Wo)

    # Blocks 2..3: Conv(no bias) + InstanceNorm(affine) + LeakyReLU
    for i in (2, 3):
        p, Ho, Wo = _im2col_folded(h, 4, 2, 1)
        P = Ho * Wo
        g = _fold_group(N, P)
        c_out = params[f"w{i}m"].shape[0]
        if g == 1:
            kern = _conv_in_lrelu_kernel
            extras = [params[f"g{i}v"], params[f"beta{i}v"]]
        else:
            kern = _conv_in_lrelu_seg_kernel
            extras = [params[f"g{i}v"], params[f"beta{i}v"], _segment_avg(g, P)]
        out = _run_layer(kern, p, params[f"w{i}m"], extras,
                         out_rows=c_out, out_dtype=jnp.bfloat16,
                         block_lanes=g * P, out_block_lanes=g * P)
        h = _unfold(out, N, Ho, Wo)

    # Block 4 + fused layer 5: Conv + IN + LeakyReLU, then the k4/p0 conv on the
    # resulting 4x4 map collapses to a per-sample dot with w5 (computed in-kernel).
    p, Ho, Wo = _im2col_folded(h, 4, 2, 1)
    assert Ho == 4 and Wo == 4, "head fusion assumes img_size == 64"
    P = Ho * Wo
    g = _fold_group(N, P)
    c4 = params["w4m"].shape[0]
    w5t = jnp.tile(params["w5p"], (1, g))            # (C4, g*P) f32
    extras = [params["g4v"], params["beta4v"], _segment_avg(g, P),
              _segment_sel(g, P), w5t, params["b5v"]]
    out = _run_layer(_conv_in_lrelu_head_kernel, p, params["w4m"], extras,
                     out_rows=1, out_dtype=jnp.float32,
                     block_lanes=g * P, out_block_lanes=g)
    return out.reshape(N, 1, 1, 1)


# ------------------------------- parameters ---------------------------------

def prepare_params(raw):
    """One-time conversion from PyTorch-layout params to kernel-ready layout:
    conv weights (C_out, C_in, kh, kw) -> (C_out, K) bf16, per-channel vectors ->
    (C_out, 1) f32 columns, layer-5 weight -> (8fd, 16) f32 for the fused head."""
    def mat(w):
        return w.reshape(w.shape[0], -1).astype(jnp.bfloat16)

    def col(v):
        return v.reshape(-1, 1).astype(jnp.float32)

    p = {"embed": raw["embed"].astype(jnp.float32),
         "w1m": mat(raw["w1"]), "b1v": col(raw["b1"])}
    for i in (2, 3, 4):
        p[f"w{i}m"] = mat(raw[f"w{i}"])
        p[f"g{i}v"] = col(raw[f"g{i}"])
        p[f"beta{i}v"] = col(raw[f"beta{i}"])
    c5 = raw["w5"].shape[1]
    p["w5p"] = raw["w5"].reshape(c5, 16).astype(jnp.float32)   # (8fd, kh*kw)
    p["b5v"] = raw["b5"].reshape(1, 1).astype(jnp.float32)
    return p


def init_params(key, channels_img, features_d, num_classes, img_size):
    fd = features_d
    keys = jax.random.split(key, 16)

    def nrm(k, shape, scale=0.05):
        return (scale * jax.random.normal(k, shape)).astype(jnp.float32)

    return {
        "embed": nrm(keys[0], (num_classes, img_size * img_size)),
        "w1": nrm(keys[1], (fd, channels_img + 1, 4, 4)),
        "b1": nrm(keys[2], (fd,)),
        "w2": nrm(keys[3], (fd * 2, fd, 4, 4)),
        "g2": 1.0 + nrm(keys[4], (fd * 2,)),
        "beta2": nrm(keys[5], (fd * 2,)),
        "w3": nrm(keys[6], (fd * 4, fd * 2, 4, 4)),
        "g3": 1.0 + nrm(keys[7], (fd * 4,)),
        "beta3": nrm(keys[8], (fd * 4,)),
        "w4": nrm(keys[9], (fd * 8, fd * 4, 4, 4)),
        "g4": 1.0 + nrm(keys[10], (fd * 8,)),
        "beta4": nrm(keys[11], (fd * 8,)),
        "w5": nrm(keys[12], (1, fd * 8, 4, 4)),
        "b5": nrm(keys[13], (1,)),
    }


if __name__ == "__main__":
    # img_size must be 64 so the final p=0, k=4 conv sees a 4x4 map.
    N, channels_img, features_d, num_classes, img_size = 2, 3, 8, 10, 64

    key = jax.random.PRNGKey(0)
    kp, kx, kl = jax.random.split(key, 3)
    raw_params = init_params(kp, channels_img, features_d, num_classes, img_size)
    params = prepare_params(raw_params)          # one-time layout conversion
    x = jax.random.normal(kx, (N, channels_img, img_size, img_size),
                          dtype=jnp.float32)
    labels = jax.random.randint(kl, (N,), 0, num_classes)

    out = discriminator_forward(params, x, labels, img_size)
    out = jax.block_until_ready(out)
    assert out.shape == (N, 1, 1, 1), out.shape
    print("KERNEL_OK")
</pallas_src>

<mosaic_0001>
module attributes {stable_mosaic.version = 11 : i64} {
  func.func @_conv_bias_lrelu_kernel(%arg0: i32, %arg1: memref<64x1024xbf16, #tpu.memory_space<vmem>>, %arg2: memref<8x64xbf16, #tpu.memory_space<vmem>>, %arg3: memref<8x1xf32, #tpu.memory_space<vmem>>, %arg4: memref<8x1024xbf16, #tpu.memory_space<vmem>>) attributes {dimension_semantics = [#tpu.dimension_semantics<parallel>], iteration_bounds = array<i64: 2>, scalar_prefetch = 0 : i64, scratch_operands = 0 : i64, tpu.core_type = #tpu.core_type<tc>, window_params = [{transform_indices = @transform_0, window_bounds = array<i64: 64, 1024>}, {pipeline_mode = #tpu.pipeline_mode<synchronous>, transform_indices = @transform_1, window_bounds = array<i64: 8, 64>}, {pipeline_mode = #tpu.pipeline_mode<synchronous>, transform_indices = @transform_2, window_bounds = array<i64: 8, 1>}, {transform_indices = @transform_3, window_bounds = array<i64: 8, 1024>}]} {
    %c0 = arith.constant 0 : index
    %c0_0 = arith.constant 0 : index
    %0 = vector.load %arg2[%c0, %c0_0] : memref<8x64xbf16, #tpu.memory_space<vmem>>, vector<8x64xbf16>
    %c0_1 = arith.constant 0 : index
    %c0_2 = arith.constant 0 : index
    %1 = vector.load %arg1[%c0_1, %c0_2] : memref<64x1024xbf16, #tpu.memory_space<vmem>>, vector<64x1024xbf16>
    %cst = arith.constant dense<0.000000e+00> : vector<8x1024xf32>
    %2 = tpu.matmul %0, %1, %cst {dimension_numbers = #tpu.dot_dimension_numbers<[1], [0], [0], [1], [0, 0, 1, 1], [], []>} : vector<8x64xbf16>, vector<64x1024xbf16>, vector<8x1024xf32> -> vector<8x1024xf32>
    %c0_3 = arith.constant 0 : index
    %c0_4 = arith.constant 0 : index
    %3 = vector.load %arg3[%c0_3, %c0_4] : memref<8x1xf32, #tpu.memory_space<vmem>>, vector<8x1xf32>
    %4 = vector.broadcast %3 : vector<8x1xf32> to vector<8x1024xf32>
    %5 = arith.addf %2, %4 : vector<8x1024xf32>
    %cst_5 = arith.constant 0.000000e+00 : f32
    %6 = vector.broadcast %cst_5 : f32 to vector<8x1024xf32>
    %7 = arith.cmpf ogt, %5, %6 : vector<8x1024xf32>
    %cst_6 = arith.constant 2.000000e-01 : f32
    %8 = vector.broadcast %cst_6 : f32 to vector<8x1024xf32>
    %9 = arith.mulf %8, %5 : vector<8x1024xf32>
    %10 = arith.select %7, %5, %9 : vector<8x1024xi1>, vector<8x1024xf32>
    %11 = arith.truncf %10 : vector<8x1024xf32> to vector<8x1024xbf16>
    %c0_7 = arith.constant 0 : index
    %c0_8 = arith.constant 0 : index
    %12 = vector.load %arg4[%c0_7, %c0_8] : memref<8x1024xbf16, #tpu.memory_space<vmem>>, vector<8x1024xbf16>
    tpu.vector_store %arg4[%c0_7, %c0_8], %11 {strides = array<i32>} : memref<8x1024xbf16, #tpu.memory_space<vmem>>, vector<8x1024xbf16>,
    return
  }
  func.func @transform_0(%arg0: i32) -> (i32, i32) {
    %c0_i32 = arith.constant 0 : i32
    %c0_i32_0 = arith.constant 0 : i32
    return %c0_i32, %arg0 : i32, i32
  }
  func.func @transform_1(%arg0: i32) -> (i32, i32) {
    %c0_i32 = arith.constant 0 : i32
    %c0_i32_0 = arith.constant 0 : i32
    %c0_i32_1 = arith.constant 0 : i32
    return %c0_i32, %c0_i32_0 : i32, i32
  }
  func.func @transform_2(%arg0: i32) -> (i32, i32) {
    %c0_i32 = arith.constant 0 : i32
    %c0_i32_0 = arith.constant 0 : i32
    %c0_i32_1 = arith.constant 0 : i32
    return %c0_i32, %c0_i32_0 : i32, i32
  }
  func.func @transform_3(%arg0: i32) -> (i32, i32) {
    %c0_i32 = arith.constant 0 : i32
    %c0_i32_0 = arith.constant 0 : i32
    return %c0_i32, %arg0 : i32, i32
  }
}

module attributes {stable_mosaic.version = 11 : i64} {
  func.func @_conv_in_lrelu_kernel(%arg0: i32, %arg1: memref<128x256xbf16, #tpu.memory_space<vmem>>, %arg2: memref<16x128xbf16, #tpu.memory_space<vmem>>, %arg3: memref<16x1xf32, #tpu.memory_space<vmem>>, %arg4: memref<16x1xf32, #tpu.memory_space<vmem>>, %arg5: memref<16x256xbf16, #tpu.memory_space<vmem>>) attributes {dimension_semantics = [#tpu.dimension_semantics<parallel>], iteration_bounds = array<i64: 2>, scalar_prefetch = 0 : i64, scratch_operands = 0 : i64, tpu.core_type = #tpu.core_type<tc>, window_params = [{transform_indices = @transform_0, window_bounds = array<i64: 128, 256>}, {pipeline_mode = #tpu.pipeline_mode<synchronous>, transform_indices = @transform_1, window_bounds = array<i64: 16, 128>}, {pipeline_mode = #tpu.pipeline_mode<synchronous>, transform_indices = @transform_2, window_bounds = array<i64: 16, 1>}, {pipeline_mode = #tpu.pipeline_mode<synchronous>, transform_indices = @transform_3, window_bounds = array<i64: 16, 1>}, {transform_indices = @transform_4, window_bounds = array<i64: 16, 256>}]} {
    %c0 = arith.constant 0 : index
    %c0_0 = arith.constant 0 : index
    %0 = vector.load %arg2[%c0, %c0_0] : memref<16x128xbf16, #tpu.memory_space<vmem>>, vector<16x128xbf16>
    %c0_1 = arith.constant 0 : index
    %c0_2 = arith.constant 0 : index
    %1 = vector.load %arg1[%c0_1, %c0_2] : memref<128x256xbf16, #tpu.memory_space<vmem>>, vector<128x256xbf16>
    %cst = arith.constant dense<0.000000e+00> : vector<16x256xf32>
    %2 = tpu.matmul %0, %1, %cst {dimension_numbers = #tpu.dot_dimension_numbers<[1], [0], [0], [1], [0, 0, 1, 1], [], []>} : vector<16x128xbf16>, vector<128x256xbf16>, vector<16x256xf32> -> vector<16x256xf32>
    %c0_3 = arith.constant 0 : index
    %c0_4 = arith.constant 0 : index
    %3 = vector.load %arg3[%c0_3, %c0_4] : memref<16x1xf32, #tpu.memory_space<vmem>>, vector<16x1xf32>
    %c0_5 = arith.constant 0 : index
    %c0_6 = arith.constant 0 : index
    %4 = vector.load %arg4[%c0_5, %c0_6] : memref<16x1xf32, #tpu.memory_space<vmem>>, vector<16x1xf32>
    %cst_7 = arith.constant dense<0.000000e+00> : vector<16xf32>
    %5 = vector.multi_reduction <add>, %2, %cst_7 [1] : vector<16x256xf32> to vector<16xf32>
    %6 = vector.shape_cast %5 : vector<16xf32> to vector<16x1xf32>
    %cst_8 = arith.constant 2.560000e+02 : f32
    %7 = vector.broadcast %cst_8 : f32 to vector<16x1xf32>
    %8 = arith.divf %6, %7 : vector<16x1xf32>
    %9 = arith.mulf %2, %2 : vector<16x256xf32>
    %cst_9 = arith.constant dense<0.000000e+00> : vector<16xf32>
    %10 = vector.multi_reduction <add>, %9, %cst_9 [1] : vector<16x256xf32> to vector<16xf32>
    %11 = vector.shape_cast %10 : vector<16xf32> to vector<16x1xf32>
    %cst_10 = arith.constant 2.560000e+02 : f32
    %12 = vector.broadcast %cst_10 : f32 to vector<16x1xf32>
    %13 = arith.divf %11, %12 : vector<16x1xf32>
    %14 = arith.mulf %8, %8 : vector<16x1xf32>
    %15 = arith.subf %13, %14 : vector<16x1xf32>
    %cst_11 = arith.constant 9.99999974E-6 : f32
    %16 = vector.broadcast %cst_11 : f32 to vector<16x1xf32>
    %17 = arith.addf %15, %16 : vector<16x1xf32>
    %18 = math.rsqrt %17 : vector<16x1xf32>
    %19 = arith.mulf %3, %18 : vector<16x1xf32>
    %20 = vector.broadcast %19 : vector<16x1xf32> to vector<16x256xf32>
    %21 = arith.mulf %2, %20 : vector<16x256xf32>
    %22 = arith.mulf %8, %19 : vector<16x1xf32>
    %23 = arith.subf %4, %22 : vector<16x1xf32>
    %24 = vector.broadcast %23 : vector<16x1xf32> to vector<16x256xf32>
    %25 = arith.addf %21, %24 : vector<16x256xf32>
    %cst_12 = arith.constant 0.000000e+00 : f32
    %26 = vector.broadcast %cst_12 : f32 to vector<16x256xf32>
    %27 = arith.cmpf ogt, %25, %26 : vector<16x256xf32>
    %cst_13 = arith.constant 2.000000e-01 : f32
    %28 = vector.broadcast %cst_13 : f32 to vector<16x256xf32>
    %29 = arith.mulf %28, %25 : vector<16x256xf32>
    %30 = arith.select %27, %25, %29 : vector<16x256xi1>, vector<16x256xf32>
    %31 = arith.truncf %30 : vector<16x256xf32> to vector<16x256xbf16>
    %c0_14 = arith.constant 0 : index
    %c0_15 = arith.constant 0 : index
    %32 = vector.load %arg5[%c0_14, %c0_15] : memref<16x256xbf16, #tpu.memory_space<vmem>>, vector<16x256xbf16>
    tpu.vector_store %arg5[%c0_14, %c0_15], %31 {strides = array<i32>} : memref<16x256xbf16, #tpu.memory_space<vmem>>, vector<16x256xbf16>,
    return
  }
  func.func @transform_0(%arg0: i32) -> (i32, i32) {
    %c0_i32 = arith.constant 0 : i32
    %c0_i32_0 = arith.constant 0 : i32
    return %c0_i32, %arg0 : i32, i32
  }
  func.func @transform_1(%arg0: i32) -> (i32, i32) {
    %c0_i32 = arith.constant 0 : i32
    %c0_i32_0 = arith.constant 0 : i32
    %c0_i32_1 = arith.constant 0 : i32
    return %c0_i32, %c0_i32_0 : i32, i32
  }
  func.func @transform_2(%arg0: i32) -> (i32, i32) {
    %c0_i32 = arith.constant 0 : i32
    %c0_i32_0 = arith.constant 0 : i32
    %c0_i32_1 = arith.constant 0 : i32
    return %c0_i32, %c0_i32_0 : i32, i32
  }
  func.func @transform_3(%arg0: i32) -> (i32, i32) {
    %c0_i32 = arith.constant 0 : i32
    %c0_i32_0 = arith.constant 0 : i32
    %c0_i32_1 = arith.constant 0 : i32
    return %c0_i32, %c0_i32_0 : i32, i32
  }
  func.func @transform_4(%arg0: i32) -> (i32, i32) {
    %c0_i32 = arith.constant 0 : i32
    %c0_i32_0 = arith.constant 0 : i32
    return %c0_i32, %arg0 : i32, i32
  }
}

module attributes {stable_mosaic.version = 11 : i64} {
  func.func @_conv_in_lrelu_seg_kernel(%arg0: i32, %arg1: memref<256x128xbf16, #tpu.memory_space<vmem>>, %arg2: memref<32x256xbf16, #tpu.memory_space<vmem>>, %arg3: memref<32x1xf32, #tpu.memory_space<vmem>>, %arg4: memref<32x1xf32, #tpu.memory_space<vmem>>, %arg5: memref<128x128xf32, #tpu.memory_space<vmem>>, %arg6: memref<32x128xbf16, #tpu.memory_space<vmem>>) attributes {dimension_semantics = [#tpu.dimension_semantics<parallel>], iteration_bounds = array<i64: 1>, scalar_prefetch = 0 : i64, scratch_operands = 0 : i64, tpu.core_type = #tpu.core_type<tc>, window_params = [{transform_indices = @transform_0, window_bounds = array<i64: 256, 128>}, {pipeline_mode = #tpu.pipeline_mode<synchronous>, transform_indices = @transform_1, window_bounds = array<i64: 32, 256>}, {pipeline_mode = #tpu.pipeline_mode<synchronous>, transform_indices = @transform_2, window_bounds = array<i64: 32, 1>}, {pipeline_mode = #tpu.pipeline_mode<synchronous>, transform_indices = @transform_3, window_bounds = array<i64: 32, 1>}, {pipeline_mode = #tpu.pipeline_mode<synchronous>, transform_indices = @transform_4, window_bounds = array<i64: 128, 128>}, {transform_indices = @transform_5, window_bounds = array<i64: 32, 128>}]} {
    %c0 = arith.constant 0 : index
    %c0_0 = arith.constant 0 : index
    %0 = vector.load %arg2[%c0, %c0_0] : memref<32x256xbf16, #tpu.memory_space<vmem>>, vector<32x256xbf16>
    %c0_1 = arith.constant 0 : index
    %c0_2 = arith.constant 0 : index
    %1 = vector.load %arg1[%c0_1, %c0_2] : memref<256x128xbf16, #tpu.memory_space<vmem>>, vector<256x128xbf16>
    %cst = arith.constant dense<0.000000e+00> : vector<32x128xf32>
    %2 = tpu.matmul %0, %1, %cst {dimension_numbers = #tpu.dot_dimension_numbers<[1], [0], [0], [1], [0, 0, 1, 1], [], []>} : vector<32x256xbf16>, vector<256x128xbf16>, vector<32x128xf32> -> vector<32x128xf32>
    %c0_3 = arith.constant 0 : index
    %c0_4 = arith.constant 0 : index
    %3 = vector.load %arg3[%c0_3, %c0_4] : memref<32x1xf32, #tpu.memory_space<vmem>>, vector<32x1xf32>
    %c0_5 = arith.constant 0 : index
    %c0_6 = arith.constant 0 : index
    %4 = vector.load %arg4[%c0_5, %c0_6] : memref<32x1xf32, #tpu.memory_space<vmem>>, vector<32x1xf32>
    %c0_7 = arith.constant 0 : index
    %c0_8 = arith.constant 0 : index
    %5 = vector.load %arg5[%c0_7, %c0_8] : memref<128x128xf32, #tpu.memory_space<vmem>>, vector<128x128xf32>
    %cst_9 = arith.constant dense<0.000000e+00> : vector<32x128xf32>
    %6 = tpu.matmul %2, %5, %cst_9 {dimension_numbers = #tpu.dot_dimension_numbers<[1], [0], [0], [1], [0, 0, 1, 1], [], []>} : vector<32x128xf32>, vector<128x128xf32>, vector<32x128xf32> -> vector<32x128xf32>
    %7 = arith.mulf %2, %2 : vector<32x128xf32>
    %cst_10 = arith.constant dense<0.000000e+00> : vector<32x128xf32>
    %8 = tpu.matmul %7, %5, %cst_10 {dimension_numbers = #tpu.dot_dimension_numbers<[1], [0], [0], [1], [0, 0, 1, 1], [], []>} : vector<32x128xf32>, vector<128x128xf32>, vector<32x128xf32> -> vector<32x128xf32>
    %9 = arith.mulf %6, %6 : vector<32x128xf32>
    %10 = arith.subf %8, %9 : vector<32x128xf32>
    %cst_11 = arith.constant 9.99999974E-6 : f32
    %11 = vector.broadcast %cst_11 : f32 to vector<32x128xf32>
    %12 = arith.addf %10, %11 : vector<32x128xf32>
    %13 = math.rsqrt %12 : vector<32x128xf32>
    %14 = vector.broadcast %3 : vector<32x1xf32> to vector<32x128xf32>
    %15 = arith.mulf %14, %13 : vector<32x128xf32>
    %16 = arith.mulf %2, %15 : vector<32x128xf32>
    %17 = arith.mulf %6, %15 : vector<32x128xf32>
    %18 = vector.broadcast %4 : vector<32x1xf32> to vector<32x128xf32>
    %19 = arith.subf %18, %17 : vector<32x128xf32>
    %20 = arith.addf %16, %19 : vector<32x128xf32>
    %cst_12 = arith.constant 0.000000e+00 : f32
    %21 = vector.broadcast %cst_12 : f32 to vector<32x128xf32>
    %22 = arith.cmpf ogt, %20, %21 : vector<32x128xf32>
    %cst_13 = arith.constant 2.000000e-01 : f32
    %23 = vector.broadcast %cst_13 : f32 to vector<32x128xf32>
    %24 = arith.mulf %23, %20 : vector<32x128xf32>
    %25 = arith.select %22, %20, %24 : vector<32x128xi1>, vector<32x128xf32>
    %26 = arith.truncf %25 : vector<32x128xf32> to vector<32x128xbf16>
    %c0_14 = arith.constant 0 : index
    %c0_15 = arith.constant 0 : index
    %27 = vector.load %arg6[%c0_14, %c0_15] : memref<32x128xbf16, #tpu.memory_space<vmem>>, vector<32x128xbf16>
    tpu.vector_store %arg6[%c0_14, %c0_15], %26 {strides = array<i32>} : memref<32x128xbf16, #tpu.memory_space<vmem>>, vector<32x128xbf16>,
    return
  }
  func.func @transform_0(%arg0: i32) -> (i32, i32) {
    %c0_i32 = arith.constant 0 : i32
    %c0_i32_0 = arith.constant 0 : i32
    return %c0_i32, %arg0 : i32, i32
  }
  func.func @transform_1(%arg0: i32) -> (i32, i32) {
    %c0_i32 = arith.constant 0 : i32
    %c0_i32_0 = arith.constant 0 : i32
    %c0_i32_1 = arith.constant 0 : i32
    return %c0_i32, %c0_i32_0 : i32, i32
  }
  func.func @transform_2(%arg0: i32) -> (i32, i32) {
    %c0_i32 = arith.constant 0 : i32
    %c0_i32_0 = arith.constant 0 : i32
    %c0_i32_1 = arith.constant 0 : i32
    return %c0_i32, %c0_i32_0 : i32, i32
  }
  func.func @transform_3(%arg0: i32) -> (i32, i32) {
    %c0_i32 = arith.constant 0 : i32
    %c0_i32_0 = arith.constant 0 : i32
    %c0_i32_1 = arith.constant 0 : i32
    return %c0_i32, %c0_i32_0 : i32, i32
  }
  func.func @transform_4(%arg0: i32) -> (i32, i32) {
    %c0_i32 = arith.constant 0 : i32
    %c0_i32_0 = arith.constant 0 : i32
    %c0_i32_1 = arith.constant 0 : i32
    return %c0_i32, %c0_i32_0 : i32, i32
  }
  func.func @transform_5(%arg0: i32) -> (i32, i32) {
    %c0_i32 = arith.constant 0 : i32
    %c0_i32_0 = arith.constant 0 : i32
    return %c0_i32, %arg0 : i32, i32
  }
}

module attributes {stable_mosaic.version = 11 : i64} {
  func.func @_conv_in_lrelu_head_kernel(%arg0: i32, %arg1: memref<512x32xbf16, #tpu.memory_space<vmem>>, %arg2: memref<64x512xbf16, #tpu.memory_space<vmem>>, %arg3: memref<64x1xf32, #tpu.memory_space<vmem>>, %arg4: memref<64x1xf32, #tpu.memory_space<vmem>>, %arg5: memref<32x32xf32, #tpu.memory_space<vmem>>, %arg6: memref<32x2xf32, #tpu.memory_space<vmem>>, %arg7: memref<64x32xf32, #tpu.memory_space<vmem>>, %arg8: memref<1x1xf32, #tpu.memory_space<vmem>>, %arg9: memref<1x2xf32, #tpu.memory_space<vmem>>) attributes {dimension_semantics = [#tpu.dimension_semantics<parallel>], iteration_bounds = array<i64: 1>, scalar_prefetch = 0 : i64, scratch_operands = 0 : i64, tpu.core_type = #tpu.core_type<tc>, window_params = [{transform_indices = @transform_0, window_bounds = array<i64: 512, 32>}, {pipeline_mode = #tpu.pipeline_mode<synchronous>, transform_indices = @transform_1, window_bounds = array<i64: 64, 512>}, {pipeline_mode = #tpu.pipeline_mode<synchronous>, transform_indices = @transform_2, window_bounds = array<i64: 64, 1>}, {pipeline_mode = #tpu.pipeline_mode<synchronous>, transform_indices = @transform_3, window_bounds = array<i64: 64, 1>}, {pipeline_mode = #tpu.pipeline_mode<synchronous>, transform_indices = @transform_4, window_bounds = array<i64: 32, 32>}, {pipeline_mode = #tpu.pipeline_mode<synchronous>, transform_indices = @transform_5, window_bounds = array<i64: 32, 2>}, {pipeline_mode = #tpu.pipeline_mode<synchronous>, transform_indices = @transform_6, window_bounds = array<i64: 64, 32>}, {pipeline_mode = #tpu.pipeline_mode<synchronous>, transform_indices = @transform_7, window_bounds = array<i64: 1, 1>}, {transform_indices = @transform_8, window_bounds = array<i64: 1, 2>}]} {
    %c0 = arith.constant 0 : index
    %c0_0 = arith.constant 0 : index
    %0 = vector.load %arg2[%c0, %c0_0] : memref<64x512xbf16, #tpu.memory_space<vmem>>, vector<64x512xbf16>
    %c0_1 = arith.constant 0 : index
    %c0_2 = arith.constant 0 : index
    %1 = vector.load %arg1[%c0_1, %c0_2] : memref<512x32xbf16, #tpu.memory_space<vmem>>, vector<512x32xbf16>
    %cst = arith.constant dense<0.000000e+00> : vector<64x32xf32>
    %2 = tpu.matmul %0, %1, %cst {dimension_numbers = #tpu.dot_dimension_numbers<[1], [0], [0], [1], [0, 0, 1, 1], [], []>} : vector<64x512xbf16>, vector<512x32xbf16>, vector<64x32xf32> -> vector<64x32xf32>
    %c0_3 = arith.constant 0 : index
    %c0_4 = arith.constant 0 : index
    %3 = vector.load %arg3[%c0_3, %c0_4] : memref<64x1xf32, #tpu.memory_space<vmem>>, vector<64x1xf32>
    %c0_5 = arith.constant 0 : index
    %c0_6 = arith.constant 0 : index
    %4 = vector.load %arg4[%c0_5, %c0_6] : memref<64x1xf32, #tpu.memory_space<vmem>>, vector<64x1xf32>
    %c0_7 = arith.constant 0 : index
    %c0_8 = arith.constant 0 : index
    %5 = vector.load %arg5[%c0_7, %c0_8] : memref<32x32xf32, #tpu.memory_space<vmem>>, vector<32x32xf32>
    %cst_9 = arith.constant dense<0.000000e+00> : vector<64x32xf32>
    %6 = tpu.matmul %2, %5, %cst_9 {dimension_numbers = #tpu.dot_dimension_numbers<[1], [0], [0], [1], [0, 0, 1, 1], [], []>} : vector<64x32xf32>, vector<32x32xf32>, vector<64x32xf32> -> vector<64x32xf32>
    %7 = arith.mulf %2, %2 : vector<64x32xf32>
    %cst_10 = arith.constant dense<0.000000e+00> : vector<64x32xf32>
    %8 = tpu.matmul %7, %5, %cst_10 {dimension_numbers = #tpu.dot_dimension_numbers<[1], [0], [0], [1], [0, 0, 1, 1], [], []>} : vector<64x32xf32>, vector<32x32xf32>, vector<64x32xf32> -> vector<64x32xf32>
    %9 = arith.mulf %6, %6 : vector<64x32xf32>
    %10 = arith.subf %8, %9 : vector<64x32xf32>
    %cst_11 = arith.constant 9.99999974E-6 : f32
    %11 = vector.broadcast %cst_11 : f32 to vector<64x32xf32>
    %12 = arith.addf %10, %11 : vector<64x32xf32>
    %13 = math.rsqrt %12 : vector<64x32xf32>
    %14 = vector.broadcast %3 : vector<64x1xf32> to vector<64x32xf32>
    %15 = arith.mulf %14, %13 : vector<64x32xf32>
    %16 = arith.mulf %2, %15 : vector<64x32xf32>
    %17 = arith.mulf %6, %15 : vector<64x32xf32>
    %18 = vector.broadcast %4 : vector<64x1xf32> to vector<64x32xf32>
    %19 = arith.subf %18, %17 : vector<64x32xf32>
    %20 = arith.addf %16, %19 : vector<64x32xf32>
    %cst_12 = arith.constant 0.000000e+00 : f32
    %21 = vector.broadcast %cst_12 : f32 to vector<64x32xf32>
    %22 = arith.cmpf ogt, %20, %21 : vector<64x32xf32>
    %cst_13 = arith.constant 2.000000e-01 : f32
    %23 = vector.broadcast %cst_13 : f32 to vector<64x32xf32>
    %24 = arith.mulf %23, %20 : vector<64x32xf32>
    %25 = arith.select %22, %20, %24 : vector<64x32xi1>, vector<64x32xf32>
    %c0_14 = arith.constant 0 : index
    %c0_15 = arith.constant 0 : index
    %26 = vector.load %arg7[%c0_14, %c0_15] : memref<64x32xf32, #tpu.memory_space<vmem>>, vector<64x32xf32>
    %27 = arith.mulf %25, %26 : vector<64x32xf32>
    %cst_16 = arith.constant dense<0.000000e+00> : vector<32xf32>
    %28 = vector.multi_reduction <add>, %27, %cst_16 [0] : vector<64x32xf32> to vector<32xf32>
    %29 = vector.shape_cast %28 : vector<32xf32> to vector<1x32xf32>
    %c0_17 = arith.constant 0 : index
    %c0_18 = arith.constant 0 : index
    %30 = vector.load %arg6[%c0_17, %c0_18] : memref<32x2xf32, #tpu.memory_space<vmem>>, vector<32x2xf32>
    %cst_19 = arith.constant dense<0.000000e+00> : vector<1x2xf32>
    %31 = tpu.matmul %29, %30, %cst_19 {dimension_numbers = #tpu.dot_dimension_numbers<[1], [0], [0], [1], [0, 0, 1, 1], [], []>} : vector<1x32xf32>, vector<32x2xf32>, vector<1x2xf32> -> vector<1x2xf32>
    %c0_20 = arith.constant 0 : index
    %c0_21 = arith.constant 0 : index
    %32 = vector.load %arg8[%c0_20, %c0_21] : memref<1x1xf32, #tpu.memory_space<vmem>>, vector<1x1xf32>
    %33 = vector.broadcast %32 : vector<1x1xf32> to vector<1x2xf32>
    %34 = arith.addf %31, %33 : vector<1x2xf32>
    %c0_22 = arith.constant 0 : index
    %c0_23 = arith.constant 0 : index
    %35 = vector.load %arg9[%c0_22, %c0_23] : memref<1x2xf32, #tpu.memory_space<vmem>>, vector<1x2xf32>
    tpu.vector_store %arg9[%c0_22, %c0_23], %34 {strides = array<i32>} : memref<1x2xf32, #tpu.memory_space<vmem>>, vector<1x2xf32>,
    return
  }
  func.func @transform_0(%arg0: i32) -> (i32, i32) {
    %c0_i32 = arith.constant 0 : i32
    %c0_i32_0 = arith.constant 0 : i32
    return %c0_i32, %arg0 : i32, i32
  }
  func.func @transform_1(%arg0: i32) -> (i32, i32) {
    %c0_i32 = arith.constant 0 : i32
    %c0_i32_0 = arith.constant 0 : i32
    %c0_i32_1 = arith.constant 0 : i32
    return %c0_i32, %c0_i32_0 : i32, i32
  }
  func.func @transform_2(%arg0: i32) -> (i32, i32) {
    %c0_i32 = arith.constant 0 : i32
    %c0_i32_0 = arith.constant 0 : i32
    %c0_i32_1 = arith.constant 0 : i32
    return %c0_i32, %c0_i32_0 : i32, i32
  }
  func.func @transform_3(%arg0: i32) -> (i32, i32) {
    %c0_i32 = arith.constant 0 : i32
    %c0_i32_0 = arith.constant 0 : i32
    %c0_i32_1 = arith.constant 0 : i32
    return %c0_i32, %c0_i32_0 : i32, i32
  }
  func.func @transform_4(%arg0: i32) -> (i32, i32) {
    %c0_i32 = arith.constant 0 : i32
    %c0_i32_0 = arith.constant 0 : i32
    %c0_i32_1 = arith.constant 0 : i32
    return %c0_i32, %c0_i32_0 : i32, i32
  }
  func.func @transform_5(%arg0: i32) -> (i32, i32) {
    %c0_i32 = arith.constant 0 : i32
    %c0_i32_0 = arith.constant 0 : i32
    %c0_i32_1 = arith.constant 0 : i32
    return %c0_i32, %c0_i32_0 : i32, i32
  }
  func.func @transform_6(%arg0: i32) -> (i32, i32) {
    %c0_i32 = arith.constant 0 : i32
    %c0_i32_0 = arith.constant 0 : i32
    %c0_i32_1 = arith.constant 0 : i32
    return %c0_i32, %c0_i32_0 : i32, i32
  }
  func.func @transform_7(%arg0: i32) -> (i32, i32) {
    %c0_i32 = arith.constant 0 : i32
    %c0_i32_0 = arith.constant 0 : i32
    %c0_i32_1 = arith.constant 0 : i32
    return %c0_i32, %c0_i32_0 : i32, i32
  }
  func.func @transform_8(%arg0: i32) -> (i32, i32) {
    %c0_i32 = arith.constant 0 : i32
    %c0_i32_0 = arith.constant 0 : i32
    return %c0_i32, %arg0 : i32, i32
  }
}

</mosaic_0001>

<bundles_post_ra>
// kernel: discriminator_forward.4
= control target key start
LH: loop header
LB: loop body
LE: loop exit
PB: predicated region body
PF: predicated region fallthrough
CT: control target
= control target key end

     0   :  { %s910_s12 = smov 0   ;;  %s912_s13 = smov 0   ;;  %s1126_s0 = inlined_call_operand.vmem [shape: bf16[64,2048], index: 0, kind: input, shape index: {}]   ;;  %s1127_s1 = inlined_call_operand.vmem [shape: bf16[8,64], index: 1, kind: input, shape index: {}]   ;;  %s1128_s2 = inlined_call_operand.vmem [shape: f32[8,1], index: 2, kind: input, shape index: {}]   ;;  %s1129_s3 = inlined_call_operand.vmem [shape: bf16[8,2048], index: 3, kind: output, shape index: {}]  }
   0x1   :  { %s914_s14 = smov 0  }
   0x2 LB: > { %s657_s15 = sadd.s32 4294967295, %s887_s14   ;;  %s927_s16 = sadd.s32 1, %s887_s14   ;;  %s887_s14 = sphi %s914_s14, %s1132_s14   ;;  %s883_s13 = sphi %s912_s13, %s1131_s13   ;;  %s879_s12 = sphi %s910_s12, %s1130_s12  }
   0x3   : > { %s17_s17 = ssub.s32 %s887_s14, %s927_s16  ;;  %s20_s18 = sadd.s32 1, %s883_s13 }
   0x4   : > { %p18_p0 = scmp.eq.s32.totalorder %s17_s17, 0  ;;  %p27_p1 = scmp.ne.s32.totalorder %s883_s13, %s879_s12 }
   0x5   : > { %p28_p2 = scmp.eq.s32.totalorder %s887_s14, 0  ;;  %p660_p4 = scmp.ge.s32.totalorder %s887_s14, 2 }
   0x6   : > { %s936_s19 = scalar_select %p18_p0, %s883_s13, %s20_s18  }
   0x7   : > { %p29_p3 = por %p28_p2, %p27_p1  ;;  %127 = sbr.rel (%p660_p4) target bundleno = 48 (0x30), region = 24 }
   0xc   : > { %130 = sbr.rel (!%p29_p3) target bundleno = 48 (0x30), region = 28  ;;  %s132_s20 = sand.u32 (%p29_p3), 1, %s883_s13  }
   0xd   : > { %s806_s21 = sshll.u32 (%p29_p3), %s887_s14, 5  ;;  %s661_s22 = sshll.u32 (%p29_p3), %s132_s20, 8 }
   0xe   : > { %s944_s25 = scalar_lea.vmem (%p29_p3), %s1126_s0, %s806_s21  ;;  %s949_s26 = scalar_lea.vmem (%p29_p3), [#allocation2], %s661_s22 }
   0xf   : > { %v150_v0 = vld [vmem:[%s944_s25] sm:$0xff] (%p29_p3)  ;;  %v152_v1 = vld [vmem:[%s944_s25 + $0x8] sm:$0xff] (%p29_p3)  ;;  %v154_v2 = vld [vmem:[%s944_s25 + $0x10] sm:$0xff] (%p29_p3) }
  0x10   : > { %151 = vst [vmem:[%s949_s26] sm:$0xff] (%p29_p3), %v150_v0  ;;  %v156_v3 = vld [vmem:[%s944_s25 + $0x18] sm:$0xff] (%p29_p3)  ;;  %v158_v4 = vld [vmem:[%s944_s25 + $0x40] sm:$0xff] (%p29_p3)  ;;  %v160_v5 = vld [vmem:[%s944_s25 + $0x48] sm:$0xff] (%p29_p3) }
  0x11   : > { %153 = vst [vmem:[%s949_s26 + $0x8] sm:$0xff] %v152_v1  ;;  %v162_v6 = vld [vmem:[%s944_s25 + $0x50] sm:$0xff]  ;;  %v164_v7 = vld [vmem:[%s944_s25 + $0x58] sm:$0xff]  ;;  %v166_v8 = vld [vmem:[%s944_s25 + $0x80] sm:$0xff] }
  0x12   : > { %155 = vst [vmem:[%s949_s26 + $0x10] sm:$0xff] %v154_v2  ;;  %v168_v9 = vld [vmem:[%s944_s25 + $0x88] sm:$0xff]  ;;  %v170_v10 = vld [vmem:[%s944_s25 + $0x90] sm:$0xff]  ;;  %v172_v11 = vld [vmem:[%s944_s25 + $0x98] sm:$0xff] }
  0x13   : > { %157 = vst [vmem:[%s949_s26 + $0x18] sm:$0xff] %v156_v3  ;;  %v174_v12 = vld [vmem:[%s944_s25 + $0xc0] sm:$0xff]  ;;  %v176_v13 = vld [vmem:[%s944_s25 + $0xc8] sm:$0xff]  ;;  %v178_v14 = vld [vmem:[%s944_s25 + $0xd0] sm:$0xff] }
  0x14   : > { %159 = vst [vmem:[%s949_s26 + $0x20] sm:$0xff] %v158_v4  ;;  %v180_v15 = vld [vmem:[%s944_s25 + $0xd8] sm:$0xff]  ;;  %v182_v16 = vld [vmem:[%s944_s25 + $0x100] sm:$0xff]  ;;  %v184_v17 = vld [vmem:[%s944_s25 + $0x108] sm:$0xff] }
  0x15   : > { %161 = vst [vmem:[%s949_s26 + $0x28] sm:$0xff] %v160_v5  ;;  %v186_v18 = vld [vmem:[%s944_s25 + $0x110] sm:$0xff]  ;;  %v188_v19 = vld [vmem:[%s944_s25 + $0x118] sm:$0xff]  ;;  %v190_v20 = vld [vmem:[%s944_s25 + $0x140] sm:$0xff] }
  0x16   : > { %163 = vst [vmem:[%s949_s26 + $0x30] sm:$0xff] %v162_v6  ;;  %v192_v21 = vld [vmem:[%s944_s25 + $0x148] sm:$0xff]  ;;  %v194_v22 = vld [vmem:[%s944_s25 + $0x150] sm:$0xff]  ;;  %v196_v23 = vld [vmem:[%s944_s25 + $0x158] sm:$0xff] }
  0x17   : > { %165 = vst [vmem:[%s949_s26 + $0x38] sm:$0xff] %v164_v7  ;;  %v198_v24 = vld [vmem:[%s944_s25 + $0x180] sm:$0xff]  ;;  %v200_v25 = vld [vmem:[%s944_s25 + $0x188] sm:$0xff]  ;;  %v202_v26 = vld [vmem:[%s944_s25 + $0x190] sm:$0xff] }
  0x18   : > { %167 = vst [vmem:[%s949_s26 + $0x40] sm:$0xff] %v166_v8  ;;  %v204_v27 = vld [vmem:[%s944_s25 + $0x198] sm:$0xff]  ;;  %v206_v28 = vld [vmem:[%s944_s25 + $0x1c0] sm:$0xff]  ;;  %v208_v29 = vld [vmem:[%s944_s25 + $0x1c8] sm:$0xff] }
  0x19   : > { %169 = vst [vmem:[%s949_s26 + $0x48] sm:$0xff] %v168_v9  ;;  %v210_v30 = vld [vmem:[%s944_s25 + $0x1d0] sm:$0xff]  ;;  %v212_v31 = vld [vmem:[%s944_s25 + $0x1d8] sm:$0xff] }
  0x1a   : > { %171 = vst [vmem:[%s949_s26 + $0x50] sm:$0xff] %v170_v10 }
  0x1b   : > { %173 = vst [vmem:[%s949_s26 + $0x58] sm:$0xff] %v172_v11 }
  0x1c   : > { %175 = vst [vmem:[%s949_s26 + $0x60] sm:$0xff] %v174_v12 }
  0x1d   : > { %177 = vst [vmem:[%s949_s26 + $0x68] sm:$0xff] %v176_v13 }
  0x1e   : > { %179 = vst [vmem:[%s949_s26 + $0x70] sm:$0xff] %v178_v14 }
  0x1f   : > { %181 = vst [vmem:[%s949_s26 + $0x78] sm:$0xff] %v180_v15 }
  0x20   : > { %183 = vst [vmem:[%s949_s26 + $0x80] sm:$0xff] %v182_v16 }
  0x21   : > { %185 = vst [vmem:[%s949_s26 + $0x88] sm:$0xff] %v184_v17 }
  0x22   : > { %187 = vst [vmem:[%s949_s26 + $0x90] sm:$0xff] %v186_v18 }
  0x23   : > { %189 = vst [vmem:[%s949_s26 + $0x98] sm:$0xff] %v188_v19 }
  0x24   : > { %191 = vst [vmem:[%s949_s26 + $0xa0] sm:$0xff] %v190_v20 }
  0x25   : > { %193 = vst [vmem:[%s949_s26 + $0xa8] sm:$0xff] %v192_v21 }
  0x26   : > { %195 = vst [vmem:[%s949_s26 + $0xb0] sm:$0xff] %v194_v22 }
  0x27   : > { %197 = vst [vmem:[%s949_s26 + $0xb8] sm:$0xff] %v196_v23 }
  0x28   : > { %199 = vst [vmem:[%s949_s26 + $0xc0] sm:$0xff] %v198_v24 }
  0x29   : > { %201 = vst [vmem:[%s949_s26 + $0xc8] sm:$0xff] %v200_v25 }
  0x2a   : > { %203 = vst [vmem:[%s949_s26 + $0xd0] sm:$0xff] %v202_v26 }
  0x2b   : > { %205 = vst [vmem:[%s949_s26 + $0xd8] sm:$0xff] %v204_v27 }
  0x2c   : > { %207 = vst [vmem:[%s949_s26 + $0xe0] sm:$0xff] %v206_v28 }
  0x2d   : > { %209 = vst [vmem:[%s949_s26 + $0xe8] sm:$0xff] %v208_v29 }
  0x2e   : > { %211 = vst [vmem:[%s949_s26 + $0xf0] sm:$0xff] %v210_v30 }
  0x2f   : > { %213 = vst [vmem:[%s949_s26 + $0xf8] sm:$0xff] %v212_v31 }
  0x30 PF: > { %p664_p5 = scmp.ge.s32.totalorder %s887_s14, 1  ;;  %p218_p6 = scmp.lt.s32.totalorder %s887_s14, 3 }
  0x32   : > { %p219_p7 = pnand %p664_p5, %p218_p6 }
  0x33   : > { %s225_s27 = sand.u32 (!%p219_p7), 1, %s879_s12   ;;  %s666_s7 = sshll.u32 (!%p219_p7), %s657_s15, 3 }
  0x34   : > { %222 = sbr.rel (%p219_p7) target bundleno = 234 (0xea), region = 51  ;;  %s665_s28 = sshll.u32 (!%p219_p7), %s225_s27, 8 }
  0x35   : > { %s1015_s29 = scalar_lea.vmem (!%p219_p7), [#allocation2], %s665_s28  ;;  %p250_p8 = scmp.lt.s32.totalorder (!%p219_p7), %s666_s7, 15 }
  0x39   : > { %v766_v32 = vld [vmem:[%s1015_s29 + $0xc0] sm:$0xf]  ;;  %v831_v34 = vld [vmem:[%s1015_s29 + $0xc4] sm:$0xf]  ;;  %v774_v37 = vld [vmem:[%s1015_s29 + $0xc8] sm:$0xf] }
  0x3a   : > { %v835_v33 = vld [vmem:[%s1015_s29 + $0xdc] sm:$0xf0]  ;;  %v768_v36 = vld [vmem:[%s1015_s29 + $0xe0] sm:$0xf0]  ;;  %v836_v38 = vld [vmem:[%s1015_s29 + $0xe4] sm:$0xf0] }
  0x3b   : > { %v767_v35 = vor.u32 %v835_v33, %v766_v32  ;;  %v771_v39 = vor.u32 %v831_v34, %v768_v36  ;;  %v775_v40 = vor.u32 %v836_v38, %v774_v37  ;;  %v832_v41 = vld [vmem:[%s1015_s29 + $0xcc] sm:$0xf]  ;;  %v734_v43 = vld [vmem:[%s1015_s29 + $0x80] sm:$0xf]  ;;  %v823_v46 = vld [vmem:[%s1015_s29 + $0x84] sm:$0xf] }
  0x3c   : > { %v776_v42 = vld [vmem:[%s1015_s29 + $0xe8] sm:$0xf0]  ;;  %v827_v45 = vld [vmem:[%s1015_s29 + $0x9c] sm:$0xf0]  ;;  %v736_v47 = vld [vmem:[%s1015_s29 + $0xa0] sm:$0xf0] }
  0x3d   : > { %463 = vmatpush.bf16.msra.mxu0 %v767_v35  ;;  %v779_v44 = vor.u32 %v832_v41, %v776_v42  ;;  %476 = vmatpush.bf16.msra.mxu1 %v771_v39  ;;  %v735_v48 = vor.u32 %v827_v45, %v734_v43  ;;  %v739_v49 = vor.u32 %v823_v46, %v736_v47  ;;  %v742_v50 = vld [vmem:[%s1015_s29 + $0x88] sm:$0xf]  ;;  %v824_v52 = vld [vmem:[%s1015_s29 + $0x8c] sm:$0xf]  ;;  %v702_v55 = vld [vmem:[%s1015_s29 + $0x40] sm:$0xf] }
  0x3e   : > { %489 = vmatpush.bf16.msra.mxu2 %v775_v40  ;;  %v828_v51 = vld [vmem:[%s1015_s29 + $0xa4] sm:$0xf0]  ;;  %v744_v54 = vld [vmem:[%s1015_s29 + $0xa8] sm:$0xf0]  ;;  %v819_v56 = vld [vmem:[%s1015_s29 + $0x5c] sm:$0xf0] }
  0x3f   : > { %502 = vmatpush.bf16.msra.mxu3 %v779_v44  ;;  %v743_v53 = vor.u32 %v828_v51, %v742_v50  ;;  %v747_v57 = vor.u32 %v824_v52, %v744_v54  ;;  %v815_v58 = vld [vmem:[%s1015_s29 + $0x44] sm:$0xf]  ;;  %v710_v60 = vld [vmem:[%s1015_s29 + $0x48] sm:$0xf]  ;;  %v703_v61 = vor.u32 %v819_v56, %v702_v55  ;;  %v816_v63 = vld [vmem:[%s1015_s29 + $0x4c] sm:$0xf] }
  0x40   : > { %v704_v59 = vld [vmem:[%s1015_s29 + $0x60] sm:$0xf0]  ;;  %v820_v62 = vld [vmem:[%s1015_s29 + $0x64] sm:$0xf0]  ;;  %v712_v0 = vld [vmem:[%s1015_s29 + $0x68] sm:$0xf0] }
  0x41   : > { %464 = vmatpush.bf16.msra.mxu0 %v735_v48  ;;  %477 = vmatpush.bf16.msra.mxu1 %v739_v49  ;;  %v707_v1 = vor.u32 %v815_v58, %v704_v59  ;;  %v711_v2 = vor.u32 %v820_v62, %v710_v60  ;;  %v670_v3 = vld [vmem:[%s1015_s29] sm:$0xf]  ;;  %v807_v5 = vld [vmem:[%s1015_s29 + $0x4] sm:$0xf]  ;;  %v715_v6 = vor.u32 %v816_v63, %v712_v0  ;;  %v678_v8 = vld [vmem:[%s1015_s29 + $0x8] sm:$0xf] }
  0x42   : > { %490 = vmatpush.bf16.msra.mxu2 %v743_v53  ;;  %v811_v4 = vld [vmem:[%s1015_s29 + $0x1c] sm:$0xf0]  ;;  %v672_v7 = vld [vmem:[%s1015_s29 + $0x20] sm:$0xf0]  ;;  %v812_v9 = vld [vmem:[%s1015_s29 + $0x24] sm:$0xf0] }
  0x43   : > { %503 = vmatpush.bf16.msra.mxu3 %v747_v57  ;;  %v808_v10 = vld [vmem:[%s1015_s29 + $0xc] sm:$0xf]  ;;  %v790_v12 = vld [vmem:[%s1015_s29 + $0xd8] sm:$0xf]  ;;  %v671_v13 = vor.u32 %v811_v4, %v670_v3  ;;  %v834_v15 = vld [vmem:[%s1015_s29 + $0xdc] sm:$0xf]  ;;  %v675_v17 = vor.u32 %v807_v5, %v672_v7  ;;  %v679_v18 = vor.u32 %v812_v9, %v678_v8 }
  0x44   : > { %v680_v11 = vld [vmem:[%s1015_s29 + $0x28] sm:$0xf0]  ;;  %v838_v14 = vld [vmem:[%s1015_s29 + $0xf4] sm:$0xf0]  ;;  %v792_v16 = vld [vmem:[%s1015_s29 + $0xf8] sm:$0xf0] }
  0x45   : > { %465 = vmatpush.bf16.msra.mxu0 %v703_v61  ;;  %478 = vmatpush.bf16.msra.mxu1 %v707_v1  ;;  %v683_v19 = vor.u32 %v808_v10, %v680_v11  ;;  %v1056_v20 = vld [vmem:[%s1127_s1] sm:$0xf]  ;;  %v791_v21 = vor.u32 %v838_v14, %v790_v12  ;;  %v782_v22 = vld [vmem:[%s1015_s29 + $0xd0] sm:$0xf]  ;;  %v833_v24 = vld [vmem:[%s1015_s29 + $0xd4] sm:$0xf]  ;;  %v795_v25 = vor.u32 %v834_v15, %v792_v16 }
  0x46   : > { %491 = vmatpush.bf16.msra.mxu2 %v711_v2  ;;  %v837_v23 = vld [vmem:[%s1015_s29 + $0xec] sm:$0xf0]  ;;  %v784_v26 = vld [vmem:[%s1015_s29 + $0xf0] sm:$0xf0]  ;;  %v758_v27 = vld [vmem:[%s1015_s29 + $0x98] sm:$0xf] }
  0x47   : > { %504 = vmatpush.bf16.msra.mxu3 %v715_v6  ;;  %v830_v28 = vld [vmem:[%s1015_s29 + $0xb4] sm:$0xf0]  ;;  %vm455_vm0 = vcmask 523264   ;;  %v826_v29 = vld [vmem:[%s1015_s29 + $0x9c] sm:$0xf]  ;;  %v783_v31 = vor.u32 %v837_v23, %v782_v22  ;;  %v787_v32 = vor.u32 %v833_v24, %v784_v26  ;;  %v289_v49 = vld [vmem:[%s1128_s2] sm:$0xff] }
  0x48   : > { %v760_v30 = vld [vmem:[%s1015_s29 + $0xb8] sm:$0xf0]  ;;  %v759_v33 = vor.u32 %v830_v28, %v758_v27  ;;  %v750_v34 = vld [vmem:[%s1015_s29 + $0x90] sm:$0xf]  ;;  %v825_v36 = vld [vmem:[%s1015_s29 + $0x94] sm:$0xf] }
  0x49   : > { %466 = vmatpush.bf16.msra.mxu0 %v671_v13  ;;  %479 = vmatpush.bf16.msra.mxu1 %v675_v17  ;;  %v829_v35 = vld [vmem:[%s1015_s29 + $0xac] sm:$0xf0]  ;;  %v763_v37 = vor.u32 %v826_v29, %v760_v30  ;;  %v752_v38 = vld [vmem:[%s1015_s29 + $0xb0] sm:$0xf0]  ;;  %v726_v39 = vld [vmem:[%s1015_s29 + $0x58] sm:$0xf] }
  0x4a   : > { %492 = vmatpush.bf16.msra.mxu2 %v679_v18  ;;  %v822_v40 = vld [vmem:[%s1015_s29 + $0x74] sm:$0xf0]  ;;  %v818_v41 = vld [vmem:[%s1015_s29 + $0x5c] sm:$0xf]  ;;  %v751_v43 = vor.u32 %v829_v35, %v750_v34  ;;  %v718_v44 = vld [vmem:[%s1015_s29 + $0x50] sm:$0xf]  ;;  %v755_v45 = vor.u32 %v825_v36, %v752_v38 }
  0x4b   : > { %505 = vmatpush.bf16.msra.mxu3 %v683_v19  ;;  %v728_v42 = vld [vmem:[%s1015_s29 + $0x78] sm:$0xf0]  ;;  %v727_v46 = vor.u32 %v822_v40, %v726_v39  ;;  %v821_v47 = vld [vmem:[%s1015_s29 + $0x6c] sm:$0xf0]  ;;  %v817_v48 = vld [vmem:[%s1015_s29 + $0x54] sm:$0xf] }
  0x4c   : > { %796 = vmatmul.msk.bf16.vlgmr.msra.gmra.mxu0 %vm455_vm0, %v1056_v20  ;;  %797 = vmatmul.msk.bf16.vlgmr.msra.gmra.mxu1 %vm455_vm0, %v1056_v20  ;;  %v731_v50 = vor.u32 %v818_v41, %v728_v42  ;;  %v720_v51 = vld [vmem:[%s1015_s29 + $0x70] sm:$0xf0]  ;;  %v694_v52 = vld [vmem:[%s1015_s29 + $0x18] sm:$0xf]  ;;  %v889_v54 = vmov 0   ;;  %v719_v57 = vor.u32 %v821_v47, %v718_v44  ;;  %s1134_s7 = smov (!%p250_p8, %s666_s7), 15 }
  0x4d   : > { %798 = vmatmul.msk.bf16.vlgmr.msra.gmra.mxu2 %vm455_vm0, %v1056_v20  ;;  %515 = vmatpush.bf16.msrb.mxu0 %v783_v31  ;;  %v814_v53 = vld [vmem:[%s1015_s29 + $0x34] sm:$0xf0]  ;;  %v810_v55 = vld [vmem:[%s1015_s29 + $0x1c] sm:$0xf]  ;;  %v723_v58 = vor.u32 %v817_v48, %v720_v51  ;;  %v686_v60 = vld [vmem:[%s1015_s29 + $0x10] sm:$0xf] }
  0x4e   : > { %541 = vmatpush.bf16.msrb.mxu2 %v791_v21  ;;  %799 = vmatmul.msk.bf16.vlgmr.msra.gmra.mxu3 %vm455_vm0, %v1056_v20  ;;  %v696_v56 = vld [vmem:[%s1015_s29 + $0x38] sm:$0xf0]  ;;  %v695_v59 = vor.u32 %v814_v53, %v694_v52  ;;  %v813_v61 = vld [vmem:[%s1015_s29 + $0x2c] sm:$0xf0]  ;;  %v809_v63 = vld [vmem:[%s1015_s29 + $0x14] sm:$0xf] }
  0x4f   : > { %554 = vmatpush.bf16.msrb.mxu3 %v795_v25  ;;  %528 = vmatpush.bf16.msrb.mxu1 %v787_v32  ;;  %v699_v62 = vor.u32 %v810_v55, %v696_v56  ;;  %v688_v0 = vld [vmem:[%s1015_s29 + $0x30] sm:$0xf0]  ;;  %v687_v1 = vor.u32 %v813_v61, %v686_v60  ;;  %s667_s8 = sshll.u32 %s1134_s7, 2 }
  0x50   : > { %864 = vset.pattern.permute.xlu0 %v889_v54  ;;  %v691_v2 = vor.u32 %v809_v63, %v688_v0  ;;  %s1110_s11 = scalar_lea.vmem %s1129_s3, %s667_s8 }
  0x51   : > { %292 = vperm.xlu0 %864, %v289_v49   ;;  %516 = vmatpush.bf16.msrb.mxu0 %v751_v43 }
  0x52   : > { %542 = vmatpush.bf16.msrb.mxu2 %v759_v33 }
  0x53   : > { %555 = vmatpush.bf16.msrb.mxu3 %v763_v37  ;;  %529 = vmatpush.bf16.msrb.mxu1 %v755_v45 }
  0x55   : > { %517 = vmatpush.bf16.msrb.mxu0 %v719_v57 }
  0x56   : > { %543 = vmatpush.bf16.msrb.mxu2 %v727_v46 }
  0x57   : > { %556 = vmatpush.bf16.msrb.mxu3 %v731_v50  ;;  %530 = vmatpush.bf16.msrb.mxu1 %v723_v58 }
  0x59   : > { %518 = vmatpush.bf16.msrb.mxu0 %v687_v1 }
  0x5a   : > { %544 = vmatpush.bf16.msrb.mxu2 %v695_v59 }
  0x5b   : > { %557 = vmatpush.bf16.msrb.mxu3 %v699_v62  ;;  %531 = vmatpush.bf16.msrb.mxu1 %v691_v2 }
  0x5c   : > { %800 = vmatmul.msk.bf16.vlgmr.msrb.gmra.mxu0 %vm455_vm0, %v1056_v20 }
  0x5d   : > { %802 = vmatmul.msk.bf16.vlgmr.msrb.gmra.mxu2 %vm455_vm0, %v1056_v20 }
  0x5e   : > { %801 = vmatmul.msk.bf16.vlgmr.msrb.gmra.mxu1 %vm455_vm0, %v1056_v20  ;;  %803 = vmatmul.msk.bf16.vlgmr.msrb.gmra.mxu3 %vm455_vm0, %v1056_v20 }
  0xc3   : > { %v293_v3 = vpop.permute.xlu0 %292 }
  0xc9   : > { %v468_v4 = vpop.f32.mrf.mxu0  ;;  %v481_v5 = vpop.f32.mrf.mxu1 }
  0xca   : > { %v469_v6 = vadd.f32 %v468_v4, %v293_v3  ;;  %v482_v7 = vadd.f32 %v481_v5, %v293_v3 }
  0xcc   : > { %vm563_vm1 = vcmp.gt.f32.partialorder %v469_v6, 0.0  ;;  %v571_v8 = vmul.f32 0.2, %v469_v6  ;;  %vm564_vm2 = vcmp.gt.f32.partialorder %v482_v7, 0.0  ;;  %v572_v9 = vmul.f32 0.2, %v482_v7 }
  0xce   : > { %v579_v10 = vsel %vm563_vm1, %v469_v6, %v571_v8  ;;  %v580_v11 = vsel %vm564_vm2, %v482_v7, %v572_v9 }
  0xcf   : > { %v587_v13 = vpack.c.bf16 %v580_v11, %v579_v10 }
  0xd0   : > { %v494_v12 = vpop.f32.mrf.mxu2 }
  0xd1   : > { %v495_v14 = vadd.f32 %v494_v12, %v293_v3  ;;  %v507_v15 = vpop.f32.mrf.mxu3  ;;  %v470_v16 = vpop.f32.mrf.mxu0  ;;  %591 = vst [vmem:[%s1110_s11] sm:$0xff] %v587_v13 }
  0xd2   : > { %v508_v17 = vadd.f32 %v507_v15, %v293_v3  ;;  %v483_v18 = vpop.f32.mrf.mxu1 }
  0xd3   : > { %vm565_vm3 = vcmp.gt.f32.partialorder %v495_v14, 0.0  ;;  %v573_v19 = vmul.f32 0.2, %v495_v14 }
  0xd4   : > { %vm566_vm4 = vcmp.gt.f32.partialorder %v508_v17, 0.0  ;;  %v574_v20 = vmul.f32 0.2, %v508_v17 }
  0xd5   : > { %v581_v21 = vsel %vm565_vm3, %v495_v14, %v573_v19 }
  0xd6   : > { %v582_v22 = vsel %vm566_vm4, %v508_v17, %v574_v20 }
  0xd7   : > { %v588_v23 = vpack.c.bf16 %v582_v22, %v581_v21 }
  0xd8   : > { %v496_v24 = vpop.f32.mrf.mxu2 }
  0xd9   : > { %592 = vst [vmem:[%s1110_s11 + $0x8] sm:$0xff] %v588_v23  ;;  %v509_v25 = vpop.f32.mrf.mxu3  ;;  %v520_v26 = vpop.f32.mrf.mxu0 }
  0xda   : > { %v521_v27 = vadd.f32 %v520_v26, %v293_v3 }
  0xdb   : > { %v533_v28 = vpop.f32.mrf.mxu1 }
  0xdc   : > { %v534_v29 = vadd.f32 %v533_v28, %v293_v3  ;;  %vm567_vm5 = vcmp.gt.f32.partialorder %v521_v27, 0.0  ;;  %v575_v30 = vmul.f32 0.2, %v521_v27 }
  0xde   : > { %vm568_vm6 = vcmp.gt.f32.partialorder %v534_v29, 0.0  ;;  %v576_v31 = vmul.f32 0.2, %v534_v29  ;;  %v583_v32 = vsel %vm567_vm5, %v521_v27, %v575_v30 }
  0xe0   : > { %v584_v33 = vsel %vm568_vm6, %v534_v29, %v576_v31  ;;  %v546_v34 = vpop.f32.mrf.mxu2 }
  0xe1   : > { %v589_v35 = vpack.c.bf16 %v584_v33, %v583_v32  ;;  %v547_v36 = vadd.f32 %v546_v34, %v293_v3  ;;  %v559_v37 = vpop.f32.mrf.mxu3  ;;  %v522_v39 = vpop.f32.mrf.mxu0 }
  0xe2   : > { %v560_v38 = vadd.f32 %v559_v37, %v293_v3 }
  0xe3   : > { %593 = vst [vmem:[%s1110_s11 + $0x10] sm:$0xff] %v589_v35  ;;  %vm569_vm7 = vcmp.gt.f32.partialorder %v547_v36, 0.0  ;;  %v577_v40 = vmul.f32 0.2, %v547_v36  ;;  %v535_v41 = vpop.f32.mrf.mxu1 }
  0xe4   : > { %vm570_vm8 = vcmp.gt.f32.partialorder %v560_v38, 0.0  ;;  %v578_v42 = vmul.f32 0.2, %v560_v38 }
  0xe5   : > { %v585_v43 = vsel %vm569_vm7, %v547_v36, %v577_v40 }
  0xe6   : > { %v586_v44 = vsel %vm570_vm8, %v560_v38, %v578_v42 }
  0xe7   : > { %v590_v45 = vpack.c.bf16 %v586_v44, %v585_v43 }
  0xe8   : > { %v548_v46 = vpop.f32.mrf.mxu2 }
  0xe9   : > { %594 = vst [vmem:[%s1110_s11 + $0x18] sm:$0xff] %v590_v45  ;;  %v561_v47 = vpop.f32.mrf.mxu3 }
  0xea PF: > { %p10_p9 = scmp.ge.s32.totalorder %s927_s16, 4   ;;  %s1130_s12 = smov %s883_s13 }
  0xeb   : > { %s1131_s13 = smov %s936_s19  ;;  %s1132_s14 = smov %s927_s16 }
  0xec   :  { %12 = sbr.rel (!%p10_p9) target bundleno = 2 (0x2), region = 90 }

// kernel: discriminator_forward.5
= control target key start
LH: loop header
LB: loop body
LE: loop exit
PB: predicated region body
PF: predicated region fallthrough
CT: control target
= control target key end

     0   :  { %s820_s15 = smov 0   ;;  %s822_s16 = smov 0   ;;  %s975_s0 = inlined_call_operand.vmem [shape: bf16[128,512], index: 0, kind: input, shape index: {}]   ;;  %s976_s1 = inlined_call_operand.vmem [shape: bf16[16,128], index: 1, kind: input, shape index: {}]   ;;  %s977_s2 = inlined_call_operand.vmem [shape: f32[16,1], index: 2, kind: input, shape index: {}]   ;;  %s978_s3 = inlined_call_operand.vmem [shape: f32[16,1], index: 3, kind: input, shape index: {}]   ;;  %s979_s4 = inlined_call_operand.vmem [shape: bf16[16,512], index: 4, kind: output, shape index: {}]  }
   0x1   :  { %s824_s17 = smov 0  }
   0x2 LB: > { %s632_s18 = sadd.s32 4294967295, %s791_s17   ;;  %s837_s19 = sadd.s32 1, %s791_s17   ;;  %s791_s17 = sphi %s824_s17, %s983_s17   ;;  %s787_s16 = sphi %s822_s16, %s982_s16   ;;  %s783_s15 = sphi %s820_s15, %s981_s15  }
   0x3   : > { %s18_s20 = ssub.s32 %s791_s17, %s837_s19  ;;  %s21_s21 = sadd.s32 1, %s787_s16 }
   0x4   : > { %p19_p0 = scmp.eq.s32.totalorder %s18_s20, 0  ;;  %p28_p1 = scmp.ne.s32.totalorder %s787_s16, %s783_s15 }
   0x5   : > { %p29_p2 = scmp.eq.s32.totalorder %s791_s17, 0  ;;  %p121_p3 = scmp.eq.s32.totalorder %s632_s18, 1 }
   0x6   : > { %s848_s22 = scalar_select %p19_p0, %s787_s16, %s21_s21  }
   0x7   : > { %p30_p4 = por %p29_p2, %p28_p1  ;;  %p850_p5 = por %p121_p3, %p28_p1 }
   0x8   : > { %p635_p6 = scmp.ge.s32.totalorder %s791_s17, 2 }
   0xa   : > { %152 = sbr.rel (%p635_p6) target bundleno = 35 (0x23), region = 28 }
   0xf   : > { %155 = sbr.rel (!%p30_p4) target bundleno = 35 (0x23), region = 32  ;;  %s157_s24 = sand.u32 (%p30_p4), 1, %s787_s16  }
  0x10   : > { %s715_s25 = sshll.u32 (%p30_p4), %s791_s17, 3  ;;  %s636_s26 = sshll.u32 (%p30_p4), %s157_s24, 7 }
  0x11   : > { %s860_s29 = scalar_lea.vmem (%p30_p4), %s975_s0, %s715_s25  ;;  %s159_s30 = scalar_lea.vmem (%p30_p4), [#allocation2], %s636_s26 }
  0x12   : > { %v221_v0 = vld [vmem:[%s860_s29] sm:$0xff] (%p30_p4)  ;;  %v223_v1 = vld [vmem:[%s860_s29 + $0x10] sm:$0xff] (%p30_p4) }
  0x13   : > { %v225_v2 = vld [vmem:[%s860_s29 + $0x20] sm:$0xff] (%p30_p4)  ;;  %222 = vst [vmem:[%s159_s30] sm:$0xff] (%p30_p4), %v221_v0  ;;  %v227_v3 = vld [vmem:[%s860_s29 + $0x30] sm:$0xff] (%p30_p4) }
  0x14   : > { %224 = vst [vmem:[%s159_s30 + $0x8] sm:$0xff] %v223_v1  ;;  %v229_v4 = vld [vmem:[%s860_s29 + $0x40] sm:$0xff]  ;;  %v231_v5 = vld [vmem:[%s860_s29 + $0x50] sm:$0xff] }
  0x15   : > { %226 = vst [vmem:[%s159_s30 + $0x10] sm:$0xff] %v225_v2  ;;  %v233_v6 = vld [vmem:[%s860_s29 + $0x60] sm:$0xff]  ;;  %v235_v7 = vld [vmem:[%s860_s29 + $0x70] sm:$0xff] }
  0x16   : > { %228 = vst [vmem:[%s159_s30 + $0x18] sm:$0xff] %v227_v3  ;;  %v237_v8 = vld [vmem:[%s860_s29 + $0x80] sm:$0xff]  ;;  %v239_v9 = vld [vmem:[%s860_s29 + $0x90] sm:$0xff] }
  0x17   : > { %230 = vst [vmem:[%s159_s30 + $0x20] sm:$0xff] %v229_v4  ;;  %v241_v10 = vld [vmem:[%s860_s29 + $0xa0] sm:$0xff]  ;;  %v243_v11 = vld [vmem:[%s860_s29 + $0xb0] sm:$0xff] }
  0x18   : > { %232 = vst [vmem:[%s159_s30 + $0x28] sm:$0xff] %v231_v5  ;;  %v245_v12 = vld [vmem:[%s860_s29 + $0xc0] sm:$0xff]  ;;  %v247_v13 = vld [vmem:[%s860_s29 + $0xd0] sm:$0xff] }
  0x19   : > { %234 = vst [vmem:[%s159_s30 + $0x30] sm:$0xff] %v233_v6  ;;  %v249_v14 = vld [vmem:[%s860_s29 + $0xe0] sm:$0xff]  ;;  %v251_v15 = vld [vmem:[%s860_s29 + $0xf0] sm:$0xff] }
  0x1a   : > { %236 = vst [vmem:[%s159_s30 + $0x38] sm:$0xff] %v235_v7 }
  0x1b   : > { %238 = vst [vmem:[%s159_s30 + $0x40] sm:$0xff] %v237_v8 }
  0x1c   : > { %240 = vst [vmem:[%s159_s30 + $0x48] sm:$0xff] %v239_v9 }
  0x1d   : > { %242 = vst [vmem:[%s159_s30 + $0x50] sm:$0xff] %v241_v10 }
  0x1e   : > { %244 = vst [vmem:[%s159_s30 + $0x58] sm:$0xff] %v243_v11 }
  0x1f   : > { %246 = vst [vmem:[%s159_s30 + $0x60] sm:$0xff] %v245_v12 }
  0x20   : > { %248 = vst [vmem:[%s159_s30 + $0x68] sm:$0xff] %v247_v13 }
  0x21   : > { %250 = vst [vmem:[%s159_s30 + $0x70] sm:$0xff] %v249_v14 }
  0x22   : > { %252 = vst [vmem:[%s159_s30 + $0x78] sm:$0xff] %v251_v15 }
  0x23 PF: > { %p639_p7 = scmp.ge.s32.totalorder %s791_s17, 1  ;;  %p257_p8 = scmp.lt.s32.totalorder %s791_s17, 3 }
  0x25   : > { %p258_p9 = pnand %p639_p7, %p257_p8 }
  0x26   : > { %s264_s5 = sand.u32 (!%p258_p9), 1, %s783_s15  }
  0x27   : > { %261 = sbr.rel (%p258_p9) target bundleno = 494 (0x1ee), region = 70  ;;  %s640_s6 = sshll.u32 (!%p258_p9), %s264_s5, 7 }
  0x28   : > { %s883_s7 = scalar_lea.vmem (!%p258_p9), [#allocation2], %s640_s6  ;;  %s641_s25 = sshll.u32 (!%p258_p9), %s264_s5, 4 }
  0x29   : > { %s287_s26 = scalar_lea.vmem (!%p258_p9), [#allocation3], %s641_s25 }
  0x2c   : > { %v704_v16 = vld [vmem:[%s883_s7 + $0x70] sm:$0xf]  ;;  %v732_v17 = vld [vmem:[%s883_s7 + $0x74] sm:$0xf0]  ;;  %v731_v18 = vld [vmem:[%s883_s7 + $0x74] sm:$0xf] }
  0x2d   : > { %v705_v19 = vor.u32 %v732_v17, %v704_v16  ;;  %v706_v20 = vld [vmem:[%s883_s7 + $0x78] sm:$0xf0]  ;;  %v696_v21 = vld [vmem:[%s883_s7 + $0x60] sm:$0xf]  ;;  %v730_v22 = vld [vmem:[%s883_s7 + $0x64] sm:$0xf0] }
  0x2e   : > { %v709_v23 = vor.u32 %v731_v18, %v706_v20  ;;  %v729_v24 = vld [vmem:[%s883_s7 + $0x64] sm:$0xf]  ;;  %v698_v25 = vld [vmem:[%s883_s7 + $0x68] sm:$0xf0]  ;;  %v697_v26 = vor.u32 %v730_v22, %v696_v21  ;;  %v688_v28 = vld [vmem:[%s883_s7 + $0x50] sm:$0xf] }
  0x2f   : > { %394 = vmatpush.bf16.msra.mxu0 %v705_v19  ;;  %v701_v27 = vor.u32 %v729_v24, %v698_v25  ;;  %v728_v29 = vld [vmem:[%s883_s7 + $0x54] sm:$0xf0]  ;;  %v727_v30 = vld [vmem:[%s883_s7 + $0x54] sm:$0xf]  ;;  %v690_v31 = vld [vmem:[%s883_s7 + $0x58] sm:$0xf0] }
  0x30   : > { %408 = vmatpush.bf16.msra.mxu1 %v709_v23  ;;  %v689_v32 = vor.u32 %v728_v29, %v688_v28  ;;  %v693_v33 = vor.u32 %v727_v30, %v690_v31  ;;  %v680_v34 = vld [vmem:[%s883_s7 + $0x40] sm:$0xf]  ;;  %v726_v35 = vld [vmem:[%s883_s7 + $0x44] sm:$0xf0]  ;;  %v725_v36 = vld [vmem:[%s883_s7 + $0x44] sm:$0xf] }
  0x31   : > { %v682_v37 = vld [vmem:[%s883_s7 + $0x48] sm:$0xf0]  ;;  %v681_v38 = vor.u32 %v726_v35, %v680_v34  ;;  %v672_v40 = vld [vmem:[%s883_s7 + $0x30] sm:$0xf]  ;;  %v724_v41 = vld [vmem:[%s883_s7 + $0x34] sm:$0xf0] }
  0x32   : > { %v685_v39 = vor.u32 %v725_v36, %v682_v37  ;;  %v723_v42 = vld [vmem:[%s883_s7 + $0x34] sm:$0xf]  ;;  %v674_v43 = vld [vmem:[%s883_s7 + $0x38] sm:$0xf0]  ;;  %v673_v44 = vor.u32 %v724_v41, %v672_v40  ;;  %v664_v46 = vld [vmem:[%s883_s7 + $0x20] sm:$0xf] }
  0x33   : > { %395 = vmatpush.bf16.msra.mxu0 %v697_v26  ;;  %v677_v45 = vor.u32 %v723_v42, %v674_v43  ;;  %v722_v47 = vld [vmem:[%s883_s7 + $0x24] sm:$0xf0]  ;;  %v721_v48 = vld [vmem:[%s883_s7 + $0x24] sm:$0xf]  ;;  %v666_v49 = vld [vmem:[%s883_s7 + $0x28] sm:$0xf0] }
  0x34   : > { %409 = vmatpush.bf16.msra.mxu1 %v701_v27  ;;  %v665_v50 = vor.u32 %v722_v47, %v664_v46  ;;  %v669_v51 = vor.u32 %v721_v48, %v666_v49  ;;  %v656_v52 = vld [vmem:[%s883_s7 + $0x10] sm:$0xf]  ;;  %v720_v53 = vld [vmem:[%s883_s7 + $0x14] sm:$0xf0]  ;;  %v719_v54 = vld [vmem:[%s883_s7 + $0x14] sm:$0xf] }
  0x35   : > { %v658_v55 = vld [vmem:[%s883_s7 + $0x18] sm:$0xf0]  ;;  %v657_v56 = vor.u32 %v720_v53, %v656_v52  ;;  %v648_v58 = vld [vmem:[%s883_s7] sm:$0xf]  ;;  %v718_v59 = vld [vmem:[%s883_s7 + $0x4] sm:$0xf0] }
  0x36   : > { %v661_v57 = vor.u32 %v719_v54, %v658_v55  ;;  %v717_v60 = vld [vmem:[%s883_s7 + $0x4] sm:$0xf]  ;;  %v650_v61 = vld [vmem:[%s883_s7 + $0x8] sm:$0xf0]  ;;  %v649_v62 = vor.u32 %v718_v59, %v648_v58  ;;  %v793_v13 = vmov 256.0   ;;  %v794_v19 = vmov 0  }
  0x37   : > { %396 = vmatpush.bf16.msra.mxu0 %v689_v32  ;;  %v653_v63 = vor.u32 %v717_v60, %v650_v61  ;;  %v716_v0 = vld [vmem:[%s976_s1] sm:$0xff]  ;;  %763 = vrcp.f32 %v793_v13  ;;  %760 = vset.pattern.permute.xlu2 %v794_v19  ;;  %v423_v52 = vld [vmem:[%s977_s2 + $0x8] sm:$0xff]  ;;  %s733_s15 = sshll.u32 (%p850_p5), %s632_s18, 3 }
  0x38   : > { %410 = vmatpush.bf16.msra.mxu1 %v693_v33  ;;  %761 = vset.pattern.permute.xlu0 %v794_v19  ;;  %v422_v42 = vld [vmem:[%s977_s2] sm:$0xff]  ;;  %s538_s29 = scalar_lea.vmem (%p850_p5), %s979_s4, %s733_s15 }
  0x39   : > { %762 = vset.pattern.permute.xlu1 %v794_v19  ;;  %v424_v48 = vld [vmem:[%s978_s3] sm:$0xff] }
  0x3b   : > { %397 = vmatpush.bf16.msra.mxu0 %v681_v38 }
  0x3c   : > { %411 = vmatpush.bf16.msra.mxu1 %v685_v39 }
  0x3d   : > { %v764_v14 = vpop.eup %763 }
  0x3e   : > { %v433_v15 = vmul.f32 256.0, %v764_v14  ;;  %vm437_vm0 = vweird.f32 %v764_v14 }
  0x3f   : > { %398 = vmatpush.bf16.msra.mxu0 %v673_v44 }
  0x40   : > { %412 = vmatpush.bf16.msra.mxu1 %v677_v45  ;;  %v434_v16 = vsub.f32 1.0, %v433_v15 }
  0x42   : > { %v435_v17 = vmul.f32 %v764_v14, %v434_v16 }
  0x43   : > { %399 = vmatpush.bf16.msra.mxu0 %v665_v50 }
  0x44   : > { %413 = vmatpush.bf16.msra.mxu1 %v669_v51  ;;  %v436_v18 = vadd.f32 %v764_v14, %v435_v17 }
  0x46   : > { %v438_v20 = vsel %vm437_vm0, %v764_v14, %v436_v18 }
  0x47   : > { %400 = vmatpush.bf16.msra.mxu0 %v657_v56  ;;  %v425_v56 = vld [vmem:[%s978_s3 + $0x8] sm:$0xff] }
  0x48   : > { %414 = vmatpush.bf16.msra.mxu1 %v661_v57 }
  0x4b   : > { %401 = vmatpush.bf16.msra.mxu0 %v649_v62 }
  0x4c   : > { %415 = vmatpush.bf16.msra.mxu1 %v653_v63 }
  0x4e   : > { %402 = vmatmul.bf16.vlgmr.msra.gmra.mxu0 %v716_v0 }
  0x4f   : > { %416 = vmatmul.bf16.vlgmr.msra.gmra.mxu1 %v716_v0 }
  0xcb   : > { %v920_v1 = vpop.f32.mrf.mxu0 }
  0xcc   : > { %v922_v2 = vpop.f32.mrf.mxu1  ;;  %v441_v3 = vmul.f32 %v920_v1, %v920_v1 }
  0xcd   : > { %v426_v4 = vadd.f32 %v922_v2, %v920_v1  ;;  %v442_v5 = vmul.f32 %v922_v2, %v922_v2 }
  0xcf   : > { %427 = vadd.xlane.f32.xlu0 %v426_v4  ;;  %v445_v6 = vadd.f32 %v442_v5, %v441_v3 }
  0xd1   : > { %446 = vadd.xlane.f32.xlu1 %v445_v6 }
  0xd3   : > { %v930_v7 = vpop.f32.mrf.mxu0 }
  0xd4   : > { %v443_v8 = vmul.f32 %v930_v7, %v930_v7  ;;  %v934_v9 = vpop.f32.mrf.mxu1 }
  0xd5   : > { %v444_v10 = vmul.f32 %v934_v9, %v934_v9  ;;  %v429_v11 = vadd.f32 %v934_v9, %v930_v7 }
  0xd7   : > { %430 = vadd.xlane.f32.xlu0 %v429_v11  ;;  %v448_v12 = vadd.f32 %v444_v10, %v443_v8 }
  0xd9   : > { %449 = vadd.xlane.f32.xlu1 %v448_v12 }
 0x142   : > { %v428_v21 = vpop.xlane.xlu0 %427 }
 0x143   : > { %v439_v22 = vmul.f32 %v438_v20, %v428_v21 }
 0x144   : > { %v447_v23 = vpop.xlane.xlu1 %446 }
 0x145   : > { %v453_v24 = vmul.f32 %v439_v22, %v439_v22  ;;  %v451_v25 = vmul.f32 %v447_v23, %v438_v20 }
 0x147   : > { %v455_v26 = vsub.f32 %v451_v25, %v453_v24 }
 0x149   : > { %v457_v27 = vadd.f32 1e-05, %v455_v26 }
 0x14a   : > { %v431_v28 = vpop.xlane.xlu0 %430 }
 0x14b   : > { %765 = vrsqrt.f32 %v457_v27  ;;  %v440_v29 = vmul.f32 %v438_v20, %v431_v28  ;;  %vm465_vm2 = vweird.f32 %v457_v27 }
 0x14c   : > { %v450_v30 = vpop.xlane.xlu1 %449 }
 0x14d   : > { %v454_v31 = vmul.f32 %v440_v29, %v440_v29  ;;  %v452_v32 = vmul.f32 %v450_v30, %v438_v20 }
 0x14f   : > { %v456_v33 = vsub.f32 %v452_v32, %v454_v31 }
 0x151   : > { %v766_v34 = vpop.eup %765  ;;  %v458_v35 = vadd.f32 1e-05, %v456_v33 }
 0x152   : > { %v460_v36 = vmul.f32 %v766_v34, %v457_v27  ;;  %vm466_vm1 = vweird.f32 %v766_v34 }
 0x153   : > { %767 = vrsqrt.f32 %v458_v35  ;;  %vm467_vm3 = vmor %vm465_vm2, %vm466_vm1  ;;  %vm475_vm5 = vweird.f32 %v458_v35 }
 0x154   : > { %v461_v37 = vmul.f32 %v766_v34, %v460_v36 }
 0x156   : > { %v462_v38 = vmul.f32 0.5, %v461_v37 }
 0x158   : > { %v463_v39 = vsub.f32 1.5, %v462_v38 }
 0x159   : > { %v768_v40 = vpop.eup %767 }
 0x15a   : > { %v470_v41 = vmul.f32 %v768_v40, %v458_v35  ;;  %v464_v43 = vmul.f32 %v766_v34, %v463_v39  ;;  %vm476_vm4 = vweird.f32 %v768_v40 }
 0x15b   : > { %vm477_vm6 = vmor %vm475_vm5, %vm476_vm4 }
 0x15c   : > { %v471_v44 = vmul.f32 %v768_v40, %v470_v41  ;;  %v468_v45 = vsel %vm467_vm3, %v766_v34, %v464_v43 }
 0x15d   : > { %v479_v46 = vmul.f32 %v468_v45, %v422_v42 }
 0x15e   : > { %v472_v47 = vmul.f32 0.5, %v471_v44 }
 0x15f   : > { %483 = vperm.xlu2 %760, %v479_v46   ;;  %v495_v49 = vmul.f32 %v479_v46, %v439_v22 }
 0x160   : > { %v473_v50 = vsub.f32 1.5, %v472_v47 }
 0x161   : > { %v497_v51 = vsub.f32 %v424_v48, %v495_v49 }
 0x162   : > { %v474_v53 = vmul.f32 %v768_v40, %v473_v50 }
 0x163   : > { %501 = vperm.xlu0 %761, %v497_v51  }
 0x164   : > { %v478_v54 = vsel %vm477_vm6, %v768_v40, %v474_v53 }
 0x165   : > { %v480_v55 = vmul.f32 %v478_v54, %v423_v52 }
 0x167   : > { %488 = vperm.xlu2 %760, %v480_v55   ;;  %v496_v57 = vmul.f32 %v480_v55, %v440_v29 }
 0x169   : > { %v498_v58 = vsub.f32 %v425_v56, %v496_v57 }
 0x16b   : > { %506 = vperm.xlu1 %762, %v498_v58  }
 0x1b9   : > { %v484_v59 = vpop.permute.xlu2 %483 }
 0x1ba   : > { %v491_v60 = vmul.f32 %v484_v59, %v920_v1  ;;  %v492_v61 = vmul.f32 %v484_v59, %v922_v2 }
 0x1c1   : > { %v489_v5 = vpop.permute.xlu2 %488 }
 0x1c2   : > { %v493_v11 = vmul.f32 %v489_v5, %v930_v7  ;;  %v494_v12 = vmul.f32 %v489_v5, %v934_v9 }
 0x1d5   : > { %v502_v62 = vpop.permute.xlu0 %501 }
 0x1d6   : > { %v509_v63 = vadd.f32 %v502_v62, %v491_v60  ;;  %v510_v0 = vadd.f32 %v502_v62, %v492_v61 }
 0x1d8   : > { %vm513_vm7 = vcmp.gt.f32.partialorder %v509_v63, 0.0  ;;  %vm514_vm8 = vcmp.gt.f32.partialorder %v510_v0, 0.0  ;;  %v517_v3 = vmul.f32 0.2, %v509_v63  ;;  %v518_v4 = vmul.f32 0.2, %v510_v0 }
 0x1da   : > { %v521_v6 = vsel %vm513_vm7, %v509_v63, %v517_v3  ;;  %v522_v8 = vsel %vm514_vm8, %v510_v0, %v518_v4 }
 0x1db   : > { %v525_v10 = vpack.c.bf16 %v522_v8, %v521_v6 }
 0x1dd   : > { %527 = vst [vmem:[%s287_s26] sm:$0xff] %v525_v10  ;;  %v507_v1 = vpop.permute.xlu1 %506 }
 0x1de   : > { %v511_v2 = vadd.f32 %v507_v1, %v493_v11  ;;  %v512_v13 = vadd.f32 %v507_v1, %v494_v12 }
 0x1e0   : > { %vm515_vm9 = vcmp.gt.f32.partialorder %v511_v2, 0.0  ;;  %vm516_vm10 = vcmp.gt.f32.partialorder %v512_v13, 0.0  ;;  %v519_v14 = vmul.f32 0.2, %v511_v2  ;;  %v520_v15 = vmul.f32 0.2, %v512_v13 }
 0x1e1   : > { %535 = sbr.rel (!%p850_p5) target bundleno = 494 (0x1ee), region = 78 }
 0x1e2   : > { %v523_v16 = vsel %vm515_vm9, %v511_v2, %v519_v14  ;;  %v524_v17 = vsel %vm516_vm10, %v512_v13, %v520_v15 }
 0x1e3   : > { %v526_v18 = vpack.c.bf16 %v524_v17, %v523_v16 }
 0x1e4   : > { %v569_v7 = vld [vmem:[%s287_s26] sm:$0xff] (%p850_p5) }
 0x1e5   : > { %528 = vst [vmem:[%s287_s26 + $0x8] sm:$0xff] %v526_v18 }
 0x1e6   : > { %570 = vst [vmem:[%s538_s29] sm:$0xff] %v569_v7 }
 0x1ec   : > { %v571_v9 = vld [vmem:[%s287_s26 + $0x8] sm:$0xff] }
 0x1ed   : > { %572 = vst [vmem:[%s538_s29 + $0x10] sm:$0xff] %v571_v9 }
 0x1ee PF: > { %p11_p10 = scmp.ge.s32.totalorder %s837_s19, 4   ;;  %s981_s15 = smov %s787_s16 }
 0x1ef   : > { %s982_s16 = smov %s848_s22  ;;  %s983_s17 = smov %s837_s19 }
 0x1f0   :  { %13 = sbr.rel (!%p11_p10) target bundleno = 2 (0x2), region = 147 }

// kernel: discriminator_forward.6
= control target key start
LH: loop header
LB: loop body
LE: loop exit
PB: predicated region body
PF: predicated region fallthrough
CT: control target
= control target key end

     0   :  { %v555_v46 = vmov 0   ;;  %s770_s0 = inlined_call_operand.vmem [shape: bf16[256,128], index: 0, kind: input, shape index: {}]   ;;  %s771_s4 = inlined_call_operand.vmem [shape: f32[128,128], index: 4, kind: input, shape index: {}]   ;;  %s772_s1 = inlined_call_operand.vmem [shape: bf16[32,256], index: 1, kind: input, shape index: {}]   ;;  %s773_s2 = inlined_call_operand.vmem [shape: f32[32,1], index: 2, kind: input, shape index: {}]   ;;  %s774_s3 = inlined_call_operand.vmem [shape: f32[32,1], index: 3, kind: input, shape index: {}]   ;;  %s775_s5 = inlined_call_operand.vmem [shape: bf16[32,128], index: 5, kind: output, shape index: {}]  }
   0x1   :  { %v523_v0 = vld [vmem:[%s770_s0 + $0x38] sm:$0xff]  ;;  %v522_v2 = vld [vmem:[%s770_s0 + $0x30] sm:$0xff]  ;;  %v521_v4 = vld [vmem:[%s770_s0 + $0x28] sm:$0xff]  ;;  %545 = vset.pattern.permute.xlu1 %v555_v46  ;;  %544 = vset.pattern.permute.xlu0 %v555_v46 }
   0x2   :  { %v531_v1 = vld [vmem:[%s770_s0 + $0x78] sm:$0xff]  ;;  %172 = vmatpush.bf16.msra.mxu0 %v523_v0  ;;  %v530_v3 = vld [vmem:[%s770_s0 + $0x70] sm:$0xff]  ;;  %v529_v5 = vld [vmem:[%s770_s0 + $0x68] sm:$0xff]  ;;  %546 = vset.pattern.permute.xlu2 %v555_v46 }
   0x3   :  { %191 = vmatpush.bf16.msra.mxu1 %v531_v1  ;;  %v520_v6 = vld [vmem:[%s770_s0 + $0x20] sm:$0xff]  ;;  %v519_v8 = vld [vmem:[%s770_s0 + $0x18] sm:$0xff]  ;;  %v518_v11 = vld [vmem:[%s770_s0 + $0x10] sm:$0xff] }
   0x4   :  { %v528_v7 = vld [vmem:[%s770_s0 + $0x60] sm:$0xff]  ;;  %v527_v9 = vld [vmem:[%s770_s0 + $0x58] sm:$0xff]  ;;  %v526_v12 = vld [vmem:[%s770_s0 + $0x50] sm:$0xff] }
   0x5   :  { %v233_v10 = vld [vmem:[%s771_s4 + $0x78] sm:$0xff]  ;;  %v232_v13 = vld [vmem:[%s771_s4 + $0x70] sm:$0xff]  ;;  %v231_v14 = vld [vmem:[%s771_s4 + $0x68] sm:$0xff] }
   0x6   :  { %173 = vmatpush.bf16.msra.mxu0 %v522_v2  ;;  %234 = vmatpush.msra.mxu2 %v233_v10  ;;  %v517_v15 = vld [vmem:[%s770_s0 + $0x8] sm:$0xff]  ;;  %v230_v17 = vld [vmem:[%s771_s4 + $0x60] sm:$0xff]  ;;  %v229_v19 = vld [vmem:[%s771_s4 + $0x58] sm:$0xff] }
   0x7   :  { %192 = vmatpush.bf16.msra.mxu1 %v530_v3  ;;  %267 = vmatpush.msra.mxu3 %v233_v10  ;;  %v525_v16 = vld [vmem:[%s770_s0 + $0x48] sm:$0xff]  ;;  %v516_v18 = vld [vmem:[%s770_s0] sm:$0xff]  ;;  %v228_v25 = vld [vmem:[%s771_s4 + $0x50] sm:$0xff] }
   0x8   :  { %235 = vmatpush.msra.mxu2 %v232_v13  ;;  %v524_v20 = vld [vmem:[%s770_s0 + $0x40] sm:$0xff]  ;;  %v513_v22 = vld [vmem:[%s772_s1 + $0x4] sm:$0xf0]  ;;  %v436_v24 = vld [vmem:[%s772_s1 + $0x8] sm:$0xf0] }
   0x9   :  { %268 = vmatpush.msra.mxu3 %v232_v13  ;;  %v434_v21 = vld [vmem:[%s772_s1] sm:$0xf]  ;;  %v512_v23 = vld [vmem:[%s772_s1 + $0x4] sm:$0xf]  ;;  %v227_v26 = vld [vmem:[%s771_s4 + $0x48] sm:$0xff] }
   0xa   :  { %174 = vmatpush.bf16.msra.mxu0 %v521_v4  ;;  %236 = vmatpush.msra.mxu2 %v231_v14  ;;  %v435_v27 = vor.u32 %v513_v22, %v434_v21  ;;  %v439_v28 = vor.u32 %v512_v23, %v436_v24  ;;  %v226_v29 = vld [vmem:[%s771_s4 + $0x40] sm:$0xff]  ;;  %v225_v30 = vld [vmem:[%s771_s4 + $0x38] sm:$0xff]  ;;  %v224_v31 = vld [vmem:[%s771_s4 + $0x30] sm:$0xff] }
   0xb   :  { %193 = vmatpush.bf16.msra.mxu1 %v529_v5  ;;  %269 = vmatpush.msra.mxu3 %v231_v14  ;;  %v223_v32 = vld [vmem:[%s771_s4 + $0x28] sm:$0xff]  ;;  %v222_v33 = vld [vmem:[%s771_s4 + $0x20] sm:$0xff]  ;;  %v442_v34 = vld [vmem:[%s772_s1 + $0x10] sm:$0xf] }
   0xc   :  { %237 = vmatpush.msra.mxu2 %v230_v17  ;;  %v221_v35 = vld [vmem:[%s771_s4 + $0x18] sm:$0xff]  ;;  %v514_v37 = vld [vmem:[%s772_s1 + $0x14] sm:$0xf]  ;;  %v219_v42 = vld [vmem:[%s771_s4 + $0x8] sm:$0xff] }
   0xd   :  { %270 = vmatpush.msra.mxu3 %v230_v17  ;;  %v515_v36 = vld [vmem:[%s772_s1 + $0x14] sm:$0xf0]  ;;  %v444_v38 = vld [vmem:[%s772_s1 + $0x18] sm:$0xf0]  ;;  %v220_v39 = vld [vmem:[%s771_s4 + $0x10] sm:$0xff] }
   0xe   :  { %175 = vmatpush.bf16.msra.mxu0 %v520_v6  ;;  %238 = vmatpush.msra.mxu2 %v229_v19  ;;  %v443_v40 = vor.u32 %v515_v36, %v442_v34  ;;  %v447_v41 = vor.u32 %v514_v37, %v444_v38  ;;  %v218_v43 = vld [vmem:[%s771_s4] sm:$0xff]  ;;  %v212_v44 = vld [vmem:[%s773_s2 + $0x10] sm:$0xff]  ;;  %v213_v52 = vld [vmem:[%s773_s2 + $0x18] sm:$0xff] }
   0xf   :  { %194 = vmatpush.bf16.msra.mxu1 %v528_v7  ;;  %271 = vmatpush.msra.mxu3 %v229_v19  ;;  %v210_v45 = vld [vmem:[%s773_s2] sm:$0xff]  ;;  %v211_v53 = vld [vmem:[%s773_s2 + $0x8] sm:$0xff]  ;;  %v217_v59 = vld [vmem:[%s774_s3 + $0x18] sm:$0xff] }
  0x10   :  { %239 = vmatpush.msra.mxu2 %v228_v25  ;;  %360 = vperm.xlu1 %545, %v212_v44   ;;  %v214_v47 = vld [vmem:[%s774_s3] sm:$0xff]  ;;  %v215_v54 = vld [vmem:[%s774_s3 + $0x8] sm:$0xff]  ;;  %v216_v60 = vld [vmem:[%s774_s3 + $0x10] sm:$0xff] }
  0x11   :  { %272 = vmatpush.msra.mxu3 %v228_v25  ;;  %350 = vperm.xlu0 %544, %v210_v45  }
  0x12   :  { %176 = vmatpush.bf16.msra.mxu0 %v519_v8  ;;  %240 = vmatpush.msra.mxu2 %v227_v26 }
  0x13   :  { %195 = vmatpush.bf16.msra.mxu1 %v527_v9  ;;  %273 = vmatpush.msra.mxu3 %v227_v26 }
  0x14   :  { %241 = vmatpush.msra.mxu2 %v226_v29  ;;  %382 = vperm.xlu2 %546, %v214_v47  }
  0x15   :  { %274 = vmatpush.msra.mxu3 %v226_v29 }
  0x16   :  { %177 = vmatpush.bf16.msra.mxu0 %v518_v11  ;;  %242 = vmatpush.msra.mxu2 %v225_v30 }
  0x17   :  { %196 = vmatpush.bf16.msra.mxu1 %v526_v12  ;;  %275 = vmatpush.msra.mxu3 %v225_v30 }
  0x18   :  { %243 = vmatpush.msra.mxu2 %v224_v31  ;;  %365 = vperm.xlu1 %545, %v213_v52  }
  0x19   :  { %276 = vmatpush.msra.mxu3 %v224_v31  ;;  %355 = vperm.xlu0 %544, %v211_v53  }
  0x1a   :  { %178 = vmatpush.bf16.msra.mxu0 %v517_v15  ;;  %244 = vmatpush.msra.mxu2 %v223_v32 }
  0x1b   :  { %197 = vmatpush.bf16.msra.mxu1 %v525_v16  ;;  %277 = vmatpush.msra.mxu3 %v223_v32 }
  0x1c   :  { %245 = vmatpush.msra.mxu2 %v222_v33  ;;  %387 = vperm.xlu2 %546, %v215_v54  }
  0x1d   :  { %278 = vmatpush.msra.mxu3 %v222_v33 }
  0x1e   :  { %179 = vmatpush.bf16.msra.mxu0 %v516_v18  ;;  %246 = vmatpush.msra.mxu2 %v221_v35 }
  0x1f   :  { %198 = vmatpush.bf16.msra.mxu1 %v524_v20  ;;  %279 = vmatpush.msra.mxu3 %v221_v35 }
  0x20   :  { %247 = vmatpush.msra.mxu2 %v220_v39  ;;  %397 = vperm.xlu1 %545, %v217_v59  }
  0x21   :  { %180 = vmatmul.bf16.vlgmr.msra.gmra.mxu0 %v435_v27  ;;  %280 = vmatpush.msra.mxu3 %v220_v39 }
  0x22   :  { %199 = vmatmul.bf16.vlgmr.msra.gmra.mxu1 %v439_v28  ;;  %248 = vmatpush.msra.mxu2 %v219_v42 }
  0x23   :  { %281 = vmatpush.msra.mxu3 %v219_v42  ;;  %392 = vperm.xlu0 %544, %v216_v60  }
  0x24   :  { %249 = vmatpush.msra.mxu2 %v218_v43 }
  0x25   :  { %282 = vmatpush.msra.mxu3 %v218_v43 }
  0x31   :  { %185 = vmatmul.bf16.gmra.mxu0 %v443_v40 }
  0x32   :  { %204 = vmatmul.bf16.gmra.mxu1 %v447_v41 }
  0x6e   :  { %v383_v32 = vpop.permute.xlu2 %382 }
  0x76   :  { %v388_v53 = vpop.permute.xlu2 %387 }
  0x82   :  { %v361_v46 = vpop.permute.xlu1 %360 }
  0x83   :  { %v351_v27 = vpop.permute.xlu0 %350 }
  0x8b   :  { %v356_v47 = vpop.permute.xlu0 %355 }
  0x9e   :  { %v181_v48 = vpop.f32.mrf.mxu0 }
  0x9f   :  { %v200_v49 = vpop.f32.mrf.mxu1 }
  0xa0   :  { %v715_v50 = vadd.f32 %v200_v49, %v181_v48 }
  0xa2   :  { %250 = vmatmul.f32.vlgmr.msra.gmra.mxu2 %v715_v50  ;;  %v263_v51 = vmul.f32 %v715_v50, %v715_v50 }
  0xa4   :  { %283 = vmatmul.f32.vlgmr.msra.gmra.mxu3 %v263_v51 }
  0xa6   :  { %v183_v55 = vpop.f32.mrf.mxu0 }
  0xa7   :  { %v202_v56 = vpop.f32.mrf.mxu1 }
  0xa8   :  { %v729_v57 = vadd.f32 %v202_v56, %v183_v55 }
  0xaa   :  { %253 = vmatmul.f32.gmra.mxu2 %v729_v57  ;;  %v264_v58 = vmul.f32 %v729_v57, %v729_v57 }
  0xac   :  { %286 = vmatmul.f32.gmra.mxu3 %v264_v58 }
  0xae   :  { %v186_v61 = vpop.f32.mrf.mxu0 }
  0xaf   :  { %v205_v62 = vpop.f32.mrf.mxu1 }
  0xb0   :  { %v740_v63 = vadd.f32 %v205_v62, %v186_v61 }
  0xb2   :  { %256 = vmatmul.f32.gmra.mxu2 %v740_v63  ;;  %v265_v0 = vmul.f32 %v740_v63, %v740_v63 }
  0xb4   :  { %289 = vmatmul.f32.gmra.mxu3 %v265_v0 }
  0xb6   :  { %v188_v1 = vpop.f32.mrf.mxu0 }
  0xb7   :  { %v207_v2 = vpop.f32.mrf.mxu1 }
  0xb8   :  { %v745_v3 = vadd.f32 %v207_v2, %v188_v1 }
  0xba   :  { %259 = vmatmul.f32.gmra.mxu2 %v745_v3  ;;  %v266_v4 = vmul.f32 %v745_v3, %v745_v3 }
  0xbc   :  { %292 = vmatmul.f32.gmra.mxu3 %v266_v4 }
 0x125   :  { %v251_v5 = vpop.f32.mrf.mxu2 }
 0x126   :  { %v296_v6 = vmul.f32 %v251_v5, %v251_v5 }
 0x127   :  { %v284_v7 = vpop.f32.mrf.mxu3 }
 0x128   :  { %v300_v8 = vsub.f32 %v284_v7, %v296_v6  ;;  %v366_v7 = vpop.permute.xlu1 %365 }
 0x12a   :  { %v304_v9 = vadd.f32 1e-05, %v300_v8 }
 0x12c   :  { %547 = vrsqrt.f32 %v304_v9  ;;  %vm314_vm1 = vweird.f32 %v304_v9 }
 0x12d   :  { %v254_v10 = vpop.f32.mrf.mxu2 }
 0x12e   :  { %v297_v11 = vmul.f32 %v254_v10, %v254_v10 }
 0x12f   :  { %v287_v12 = vpop.f32.mrf.mxu3 }
 0x130   :  { %v301_v13 = vsub.f32 %v287_v12, %v297_v11 }
 0x132   :  { %v548_v14 = vpop.eup %547  ;;  %v305_v15 = vadd.f32 1e-05, %v301_v13  ;;  %v393_v13 = vpop.permute.xlu0 %392 }
 0x133   :  { %v309_v16 = vmul.f32 %v548_v14, %v304_v9  ;;  %vm315_vm0 = vweird.f32 %v548_v14 }
 0x134   :  { %549 = vrsqrt.f32 %v305_v15  ;;  %vm316_vm2 = vmor %vm314_vm1, %vm315_vm0  ;;  %vm324_vm4 = vweird.f32 %v305_v15 }
 0x135   :  { %v310_v17 = vmul.f32 %v548_v14, %v309_v16  ;;  %v750_v18 = vpop.f32.mrf.mxu2 }
 0x136   :  { %v298_v19 = vmul.f32 %v750_v18, %v750_v18 }
 0x137   :  { %v311_v20 = vmul.f32 0.5, %v310_v17  ;;  %v290_v21 = vpop.f32.mrf.mxu3 }
 0x138   :  { %v302_v22 = vsub.f32 %v290_v21, %v298_v19 }
 0x139   :  { %v312_v23 = vsub.f32 1.5, %v311_v20 }
 0x13a   :  { %v550_v24 = vpop.eup %549  ;;  %v306_v25 = vadd.f32 1e-05, %v302_v22 }
 0x13b   :  { %v319_v26 = vmul.f32 %v550_v24, %v305_v15  ;;  %v313_v28 = vmul.f32 %v548_v14, %v312_v23  ;;  %vm325_vm3 = vweird.f32 %v550_v24 }
 0x13c   :  { %551 = vrsqrt.f32 %v306_v25  ;;  %vm326_vm5 = vmor %vm324_vm4, %vm325_vm3  ;;  %vm334_vm7 = vweird.f32 %v306_v25 }
 0x13d   :  { %v320_v29 = vmul.f32 %v550_v24, %v319_v26  ;;  %v317_v30 = vsel %vm316_vm2, %v548_v14, %v313_v28  ;;  %v754_v31 = vpop.f32.mrf.mxu2 }
 0x13e   :  { %v368_v33 = vmul.f32 %v351_v27, %v317_v30  ;;  %v299_v34 = vmul.f32 %v754_v31, %v754_v31 }
 0x13f   :  { %v321_v35 = vmul.f32 0.5, %v320_v29  ;;  %v293_v36 = vpop.f32.mrf.mxu3 }
 0x140   :  { %v303_v37 = vsub.f32 %v293_v36, %v299_v34  ;;  %v376_v38 = vmul.f32 %v368_v33, %v251_v5  ;;  %v372_v49 = vmul.f32 %v368_v33, %v715_v50 }
 0x141   :  { %v322_v39 = vsub.f32 1.5, %v321_v35 }
 0x142   :  { %v552_v40 = vpop.eup %551  ;;  %v307_v41 = vadd.f32 1e-05, %v303_v37  ;;  %v400_v44 = vsub.f32 %v383_v32, %v376_v38 }
 0x143   :  { %v329_v42 = vmul.f32 %v552_v40, %v306_v25  ;;  %v323_v43 = vmul.f32 %v550_v24, %v322_v39  ;;  %vm335_vm6 = vweird.f32 %v552_v40 }
 0x144   :  { %553 = vrsqrt.f32 %v307_v41  ;;  %v404_v54 = vadd.f32 %v400_v44, %v372_v49  ;;  %vm336_vm8 = vmor %vm334_vm7, %vm335_vm6  ;;  %vm344_vm12 = vweird.f32 %v307_v41 }
 0x145   :  { %v330_v45 = vmul.f32 %v552_v40, %v329_v42  ;;  %v327_v48 = vsel %vm326_vm5, %v550_v24, %v323_v43 }
 0x146   :  { %v369_v51 = vmul.f32 %v356_v47, %v327_v48  ;;  %v412_v0 = vmul.f32 0.2, %v404_v54  ;;  %vm408_vm9 = vcmp.gt.f32.partialorder %v404_v54, 0.0 }
 0x147   :  { %v331_v52 = vmul.f32 0.5, %v330_v45 }
 0x148   :  { %v377_v55 = vmul.f32 %v369_v51, %v254_v10  ;;  %v373_v59 = vmul.f32 %v369_v51, %v729_v57  ;;  %v416_v8 = vsel %vm408_vm9, %v404_v54, %v412_v0 }
 0x149   :  { %v332_v56 = vsub.f32 1.5, %v331_v52 }
 0x14a   :  { %v554_v58 = vpop.eup %553  ;;  %v401_v60 = vsub.f32 %v388_v53, %v377_v55 }
 0x14b   :  { %v333_v61 = vmul.f32 %v552_v40, %v332_v56  ;;  %v339_v62 = vmul.f32 %v554_v58, %v307_v41  ;;  %vm345_vm11 = vweird.f32 %v554_v58 }
 0x14c   :  { %v405_v1 = vadd.f32 %v401_v60, %v373_v59  ;;  %vm346_vm13 = vmor %vm344_vm12, %vm345_vm11 }
 0x14d   :  { %v337_v2 = vsel %vm336_vm8, %v552_v40, %v333_v61  ;;  %v340_v4 = vmul.f32 %v554_v58, %v339_v62 }
 0x14e   :  { %v370_v50 = vmul.f32 %v361_v46, %v337_v2  ;;  %vm409_vm10 = vcmp.gt.f32.partialorder %v405_v1, 0.0  ;;  %v413_v5 = vmul.f32 0.2, %v405_v1 }
 0x14f   :  { %v341_v6 = vmul.f32 0.5, %v340_v4 }
 0x150   :  { %v417_v9 = vsel %vm409_vm10, %v405_v1, %v413_v5  ;;  %v378_v10 = vmul.f32 %v370_v50, %v750_v18  ;;  %v374_v16 = vmul.f32 %v370_v50, %v740_v63  ;;  %v398_v18 = vpop.permute.xlu1 %397 }
 0x151   :  { %v342_v57 = vsub.f32 1.5, %v341_v6  ;;  %v535_v11 = vpack.c.bf16 %v417_v9, %v416_v8 }
 0x152   :  { %v402_v14 = vsub.f32 %v393_v13, %v378_v10 }
 0x153   :  { %v343_v12 = vmul.f32 %v554_v58, %v342_v57  ;;  %536 = vst [vmem:[%s775_s5] sm:$0xff] %v535_v11  }
 0x154   :  { %v406_v20 = vadd.f32 %v402_v14, %v374_v16 }
 0x155   :  { %v347_v15 = vsel %vm346_vm13, %v554_v58, %v343_v12 }
 0x156   :  { %v371_v17 = vmul.f32 %v366_v7, %v347_v15  ;;  %v414_v24 = vmul.f32 0.2, %v406_v20  ;;  %vm410_vm14 = vcmp.gt.f32.partialorder %v406_v20, 0.0 }
 0x158   :  { %v379_v19 = vmul.f32 %v371_v17, %v754_v31  ;;  %v375_v21 = vmul.f32 %v371_v17, %v745_v3  ;;  %v418_v27 = vsel %vm410_vm14, %v406_v20, %v414_v24 }
 0x15a   :  { %v403_v22 = vsub.f32 %v398_v18, %v379_v19 }
 0x15c   :  { %v407_v23 = vadd.f32 %v403_v22, %v375_v21 }
 0x15e   :  { %vm411_vm15 = vcmp.gt.f32.partialorder %v407_v23, 0.0  ;;  %v415_v25 = vmul.f32 0.2, %v407_v23 }
 0x160   :  { %v419_v26 = vsel %vm411_vm15, %v407_v23, %v415_v25 }
 0x161   :  { %v540_v28 = vpack.c.bf16 %v419_v26, %v418_v27 }
 0x163   :  { %542 = vst [vmem:[%s775_s5 + $0x8] sm:$0xff] %v540_v28  }

// kernel: discriminator_forward.7
= control target key start
LH: loop header
LB: loop body
LE: loop exit
PB: predicated region body
PF: predicated region fallthrough
CT: control target
= control target key end

     0   :  { %s1858_s0 = inlined_call_operand.vmem [shape: bf16[512,32], index: 0, kind: input, shape index: {}]   ;;  %s1859_s1 = inlined_call_operand.vmem [shape: bf16[64,512], index: 1, kind: input, shape index: {}]   ;;  %s1860_s2 = inlined_call_operand.vmem [shape: f32[64,1], index: 2, kind: input, shape index: {}]   ;;  %s1861_s3 = inlined_call_operand.vmem [shape: f32[64,1], index: 3, kind: input, shape index: {}]   ;;  %s1862_s4 = inlined_call_operand.vmem [shape: f32[32,32], index: 4, kind: input, shape index: {}]   ;;  %s1863_s5 = inlined_call_operand.vmem [shape: f32[32,2], index: 5, kind: input, shape index: {}]   ;;  %s1864_s6 = inlined_call_operand.vmem [shape: f32[64,32], index: 6, kind: input, shape index: {}]   ;;  %s1865_s7 = inlined_call_operand.<no memory space> [shape: f32[1,1], index: 7, kind: input, shape index: {}]   ;;  %s1866_s8 = inlined_call_operand.hbm [shape: f32[1,2], index: 8, kind: output, shape index: {}]  }
   0x1   :  { %v13_v0 = vstv %s1865_s7 }
   0x2   :  { %14 = vst [vmem:[#allocation2] sm:$0x1] %v13_v0 }
   0x3   :  { %v1228_v1 = vld [vmem:[%s1858_s0 + $0x38] sm:$0xff]  ;;  %v1227_v5 = vld [vmem:[%s1858_s0 + $0x30] sm:$0xff]  ;;  %v1226_v9 = vld [vmem:[%s1858_s0 + $0x28] sm:$0xff] }
   0x4   :  { %v1236_v2 = vld [vmem:[%s1858_s0 + $0x78] sm:$0xff]  ;;  %384 = vmatpush.bf16.msra.mxu0 %v1228_v1  ;;  %v1235_v6 = vld [vmem:[%s1858_s0 + $0x70] sm:$0xff]  ;;  %v1234_v10 = vld [vmem:[%s1858_s0 + $0x68] sm:$0xff] }
   0x5   :  { %v1244_v3 = vld [vmem:[%s1858_s0 + $0xb8] sm:$0xff]  ;;  %413 = vmatpush.bf16.msra.mxu1 %v1236_v2  ;;  %v1243_v7 = vld [vmem:[%s1858_s0 + $0xb0] sm:$0xff]  ;;  %v1242_v11 = vld [vmem:[%s1858_s0 + $0xa8] sm:$0xff] }
   0x6   :  { %v1252_v4 = vld [vmem:[%s1858_s0 + $0xf8] sm:$0xff]  ;;  %442 = vmatpush.bf16.msra.mxu2 %v1244_v3  ;;  %v1251_v8 = vld [vmem:[%s1858_s0 + $0xf0] sm:$0xff]  ;;  %v1250_v12 = vld [vmem:[%s1858_s0 + $0xe8] sm:$0xff] }
   0x7   :  { %471 = vmatpush.bf16.msra.mxu3 %v1252_v4  ;;  %v1225_v13 = vld [vmem:[%s1858_s0 + $0x20] sm:$0xff]  ;;  %v1224_v17 = vld [vmem:[%s1858_s0 + $0x18] sm:$0xff] }
   0x8   :  { %385 = vmatpush.bf16.msra.mxu0 %v1227_v5  ;;  %v1233_v14 = vld [vmem:[%s1858_s0 + $0x60] sm:$0xff]  ;;  %v1232_v18 = vld [vmem:[%s1858_s0 + $0x58] sm:$0xff] }
   0x9   :  { %414 = vmatpush.bf16.msra.mxu1 %v1235_v6  ;;  %v1241_v15 = vld [vmem:[%s1858_s0 + $0xa0] sm:$0xff] }
   0xa   :  { %443 = vmatpush.bf16.msra.mxu2 %v1243_v7  ;;  %v1249_v16 = vld [vmem:[%s1858_s0 + $0xe0] sm:$0xff] }
   0xb   :  { %472 = vmatpush.bf16.msra.mxu3 %v1251_v8 }
   0xc   :  { %386 = vmatpush.bf16.msra.mxu0 %v1226_v9 }
   0xd   :  { %415 = vmatpush.bf16.msra.mxu1 %v1234_v10 }
   0xe   :  { %444 = vmatpush.bf16.msra.mxu2 %v1242_v11 }
   0xf   :  { %473 = vmatpush.bf16.msra.mxu3 %v1250_v12 }
  0x10   :  { %387 = vmatpush.bf16.msra.mxu0 %v1225_v13 }
  0x11   :  { %416 = vmatpush.bf16.msra.mxu1 %v1233_v14 }
  0x12   :  { %15 = vsyncpa [#allocation4], 0  ;;  %445 = vmatpush.bf16.msra.mxu2 %v1241_v15  ;;  %v1240_v19 = vld [vmem:[%s1858_s0 + $0x98] sm:$0xff]  ;;  %v1223_v21 = vld [vmem:[%s1858_s0 + $0x10] sm:$0xff]  ;;  %vm520_vm0 = vcmask 261120   ;;  %s1309_s24 = smov [#allocation3]  }
  0x13   :  { %474 = vmatpush.bf16.msra.mxu3 %v1249_v16  ;;  %v1248_v20 = vld [vmem:[%s1858_s0 + $0xd8] sm:$0xff]  ;;  %v1231_v22 = vld [vmem:[%s1858_s0 + $0x50] sm:$0xff]  ;;  %v1222_v25 = vld [vmem:[%s1858_s0 + $0x8] sm:$0xff] }
  0x14   :  { %388 = vmatpush.bf16.msra.mxu0 %v1224_v17  ;;  %v1239_v23 = vld [vmem:[%s1858_s0 + $0x90] sm:$0xff]  ;;  %v1230_v26 = vld [vmem:[%s1858_s0 + $0x48] sm:$0xff]  ;;  %v1221_v29 = vld [vmem:[%s1858_s0] sm:$0xff] }
  0x15   :  { %417 = vmatpush.bf16.msra.mxu1 %v1232_v18  ;;  %v1247_v24 = vld [vmem:[%s1858_s0 + $0xd0] sm:$0xff]  ;;  %v1238_v27 = vld [vmem:[%s1858_s0 + $0x88] sm:$0xff]  ;;  %v1229_v30 = vld [vmem:[%s1858_s0 + $0x40] sm:$0xff] }
  0x16   :  { %446 = vmatpush.bf16.msra.mxu2 %v1240_v19  ;;  %v1246_v28 = vld [vmem:[%s1858_s0 + $0xc8] sm:$0xff]  ;;  %v1237_v31 = vld [vmem:[%s1858_s0 + $0x80] sm:$0xff]  ;;  %v1207_v34 = vld [vmem:[%s1859_s1 + $0xc] sm:$0xf0] }
  0x17   :  { %475 = vmatpush.bf16.msra.mxu3 %v1248_v20  ;;  %v1245_v32 = vld [vmem:[%s1858_s0 + $0xc0] sm:$0xff]  ;;  %v1000_v36 = vld [vmem:[%s1859_s1 + $0x10] sm:$0xf0]  ;;  %v1006_v37 = vld [vmem:[%s1859_s1 + $0x8] sm:$0xf] }
  0x18   :  { %389 = vmatpush.bf16.msra.mxu0 %v1223_v21  ;;  %v998_v33 = vld [vmem:[%s1859_s1] sm:$0xf]  ;;  %v1205_v35 = vld [vmem:[%s1859_s1 + $0x4] sm:$0xf]  ;;  %v1208_v38 = vld [vmem:[%s1859_s1 + $0x14] sm:$0xf0] }
  0x19   :  { %418 = vmatpush.bf16.msra.mxu1 %v1231_v22  ;;  %v1206_v39 = vld [vmem:[%s1859_s1 + $0xc] sm:$0xf]  ;;  %v1008_v40 = vld [vmem:[%s1859_s1 + $0x18] sm:$0xf0]  ;;  %v999_v41 = vor.u32 %v1207_v34, %v998_v33  ;;  %v1003_v42 = vor.u32 %v1205_v35, %v1000_v36  ;;  %v1007_v43 = vor.u32 %v1208_v38, %v1006_v37  ;;  %v1014_v45 = vld [vmem:[%s1859_s1 + $0x20] sm:$0xf] }
  0x1a   :  { %447 = vmatpush.bf16.msra.mxu2 %v1239_v23  ;;  %v1011_v44 = vor.u32 %v1206_v39, %v1008_v40  ;;  %v1211_v46 = vld [vmem:[%s1859_s1 + $0x2c] sm:$0xf0]  ;;  %v1209_v47 = vld [vmem:[%s1859_s1 + $0x24] sm:$0xf]  ;;  %v1016_v48 = vld [vmem:[%s1859_s1 + $0x30] sm:$0xf0] }
  0x1b   :  { %476 = vmatpush.bf16.msra.mxu3 %v1247_v24  ;;  %v1022_v49 = vld [vmem:[%s1859_s1 + $0x28] sm:$0xf]  ;;  %v1212_v50 = vld [vmem:[%s1859_s1 + $0x34] sm:$0xf0]  ;;  %v1210_v51 = vld [vmem:[%s1859_s1 + $0x2c] sm:$0xf]  ;;  %v1015_v53 = vor.u32 %v1211_v46, %v1014_v45  ;;  %v1019_v54 = vor.u32 %v1209_v47, %v1016_v48 }
  0x1c   :  { %390 = vmatpush.bf16.msra.mxu0 %v1222_v25  ;;  %v1024_v52 = vld [vmem:[%s1859_s1 + $0x38] sm:$0xf0]  ;;  %v1023_v55 = vor.u32 %v1212_v50, %v1022_v49  ;;  %v518_v58 = vld [vmem:[%s1862_s4 + $0x10] sm:$0xff]  ;;  %v1030_v59 = vld [vmem:[%s1859_s1 + $0x40] sm:$0xf]  ;;  %v1308_v23 = vmov 0  }
  0x1d   :  { %419 = vmatpush.bf16.msra.mxu1 %v1230_v26  ;;  %v1027_v56 = vor.u32 %v1210_v51, %v1024_v52  ;;  %v519_v57 = vld [vmem:[%s1862_s4 + $0x18] sm:$0xff]  ;;  %v1215_v60 = vld [vmem:[%s1859_s1 + $0x4c] sm:$0xf0]  ;;  %v1213_v61 = vld [vmem:[%s1859_s1 + $0x44] sm:$0xf]  ;;  %1263 = vset.pattern.permute.xlu0 %v1308_v23 }
  0x1e   :  { %448 = vmatpush.bf16.msra.mxu2 %v1238_v27  ;;  %v1032_v62 = vld [vmem:[%s1859_s1 + $0x50] sm:$0xf0]  ;;  %v1038_v63 = vld [vmem:[%s1859_s1 + $0x48] sm:$0xf]  ;;  %v1216_v0 = vld [vmem:[%s1859_s1 + $0x54] sm:$0xf0]  ;;  %v1031_v3 = vor.u32 %v1215_v60, %v1030_v59  ;;  %1264 = vset.pattern.permute.xlu1 %v1308_v23 }
  0x1f   :  { %477 = vmatpush.bf16.msra.mxu3 %v1246_v28  ;;  %v1214_v1 = vld [vmem:[%s1859_s1 + $0x4c] sm:$0xf]  ;;  %v1040_v2 = vld [vmem:[%s1859_s1 + $0x58] sm:$0xf0]  ;;  %v1035_v4 = vor.u32 %v1213_v61, %v1032_v62  ;;  %v1039_v5 = vor.u32 %v1216_v0, %v1038_v63  ;;  %v1046_v7 = vld [vmem:[%s1859_s1 + $0x60] sm:$0xf]  ;;  %1265 = vset.pattern.permute.xlu2 %v1308_v23 }
  0x20   :  { %391 = vmatpush.bf16.msra.mxu0 %v1221_v29  ;;  %v1043_v6 = vor.u32 %v1214_v1, %v1040_v2  ;;  %v1219_v8 = vld [vmem:[%s1859_s1 + $0x6c] sm:$0xf0]  ;;  %v1217_v9 = vld [vmem:[%s1859_s1 + $0x64] sm:$0xf]  ;;  %v1048_v10 = vld [vmem:[%s1859_s1 + $0x70] sm:$0xf0] }
  0x21   :  { %420 = vmatpush.bf16.msra.mxu1 %v1229_v30  ;;  %v1054_v11 = vld [vmem:[%s1859_s1 + $0x68] sm:$0xf]  ;;  %v1220_v12 = vld [vmem:[%s1859_s1 + $0x74] sm:$0xf0]  ;;  %v1218_v13 = vld [vmem:[%s1859_s1 + $0x6c] sm:$0xf]  ;;  %v1047_v15 = vor.u32 %v1219_v8, %v1046_v7  ;;  %v1051_v16 = vor.u32 %v1217_v9, %v1048_v10 }
  0x22   :  { %449 = vmatpush.bf16.msra.mxu2 %v1237_v31  ;;  %v1056_v14 = vld [vmem:[%s1859_s1 + $0x78] sm:$0xf0]  ;;  %v1055_v17 = vor.u32 %v1220_v12, %v1054_v11  ;;  %v517_v19 = vld [vmem:[%s1862_s4 + $0x8] sm:$0xff]  ;;  %v516_v20 = vld [vmem:[%s1862_s4] sm:$0xff] }
  0x23   :  { %478 = vmatpush.bf16.msra.mxu3 %v1245_v32  ;;  %392 = vmatmul.bf16.vlgmr.msra.gmra.mxu0 %v999_v41  ;;  %v1059_v18 = vor.u32 %v1218_v13, %v1056_v14  ;;  %v500_v24 = vld [vmem:[%s1860_s2] sm:$0xff]  ;;  %v502_v26 = vld [vmem:[%s1860_s2 + $0x10] sm:$0xff]  ;;  %v501_v32 = vld [vmem:[%s1860_s2 + $0x8] sm:$0xff] }
  0x24   :  { %421 = vmatmul.bf16.vlgmr.msra.gmra.mxu1 %v1003_v42  ;;  %557 = vmatpush.msrb.mxu0 %v519_v57  ;;  %v503_v35 = vld [vmem:[%s1860_s2 + $0x18] sm:$0xff]  ;;  %v504_v42 = vld [vmem:[%s1860_s2 + $0x20] sm:$0xff]  ;;  %v510_v46 = vld [vmem:[%s1861_s3 + $0x10] sm:$0xff] }
  0x25   :  { %450 = vmatmul.bf16.vlgmr.msra.gmra.mxu2 %v1007_v43  ;;  %630 = vmatpush.msrb.mxu1 %v519_v57  ;;  %v511_v52 = vld [vmem:[%s1861_s3 + $0x18] sm:$0xff]  ;;  %v513_v2 = vld [vmem:[%s1861_s3 + $0x28] sm:$0xff]  ;;  %v948_v11 = vld [vmem:[#allocation2] sm:$0x1] }
  0x26   :  { %479 = vmatmul.bf16.vlgmr.msra.gmra.mxu3 %v1011_v44  ;;  %1257 = vmatpush.msrb.mxu2 %v519_v57  ;;  %v507_v62 = vld [vmem:[%s1860_s2 + $0x38] sm:$0xff]  ;;  %v509_v13 = vld [vmem:[%s1861_s3 + $0x8] sm:$0xff] }
  0x27   :  { %1253 = vmatpush.msrb.mxu3 %v519_v57  ;;  %558 = vmatpush.msrb.mxu0 %v518_v58  ;;  %v505_v23 = vld [vmem:[%s1860_s2 + $0x28] sm:$0xff] }
  0x28   :  { %631 = vmatpush.msrb.mxu1 %v518_v58  ;;  %1258 = vmatpush.msrb.mxu2 %v518_v58 }
  0x29   :  { %1254 = vmatpush.msrb.mxu3 %v518_v58  ;;  %559 = vmatpush.msrb.mxu0 %v517_v19 }
  0x2a   :  { %632 = vmatpush.msrb.mxu1 %v517_v19  ;;  %1259 = vmatpush.msrb.mxu2 %v517_v19 }
  0x2b   :  { %1255 = vmatpush.msrb.mxu3 %v517_v19  ;;  %560 = vmatpush.msrb.mxu0 %v516_v20 }
  0x2c   :  { %633 = vmatpush.msrb.mxu1 %v516_v20  ;;  %1260 = vmatpush.msrb.mxu2 %v516_v20 }
  0x2d   :  { %1256 = vmatpush.msrb.mxu3 %v516_v20  ;;  %765 = vperm.xlu0 %1263, %v500_v24  }
  0x2e   :  { %775 = vperm.xlu1 %1264, %v502_v26  }
  0x33   :  { %397 = vmatmul.bf16.gmra.mxu0 %v1015_v53 }
  0x34   :  { %426 = vmatmul.bf16.gmra.mxu1 %v1019_v54 }
  0x35   :  { %455 = vmatmul.bf16.gmra.mxu2 %v1023_v55  ;;  %770 = vperm.xlu0 %1263, %v501_v32   ;;  %v506_v55 = vld [vmem:[%s1860_s2 + $0x30] sm:$0xff]  ;;  %s987_s2 = sshll.u32 %s1866_s8, 4  ;;  %s988_s2 = int_to_ptr.hbm [resolvable:$true] %s987_s2 }
  0x36   :  { %484 = vmatmul.bf16.gmra.mxu3 %v1027_v56  ;;  %780 = vperm.xlu1 %1264, %v503_v35  }
  0x3d   :  { %785 = vperm.xlu0 %1263, %v504_v42  }
  0x3e   :  { %839 = vperm.xlu1 %1264, %v510_v46  }
  0x43   :  { %402 = vmatmul.bf16.gmra.mxu0 %v1031_v3  ;;  %v508_v3 = vld [vmem:[%s1861_s3] sm:$0xff] }
  0x44   :  { %431 = vmatmul.bf16.gmra.mxu1 %v1035_v4  ;;  %v515_v4 = vld [vmem:[%s1861_s3 + $0x38] sm:$0xff]  ;;  %829 = vperm.xlu2 %1265, %v508_v3  }
  0x45   :  { %460 = vmatmul.bf16.gmra.mxu2 %v1039_v5  ;;  %844 = vperm.xlu0 %1263, %v511_v52  }
  0x46   :  { %489 = vmatmul.bf16.gmra.mxu3 %v1043_v6  ;;  %795 = vperm.xlu1 %1264, %v506_v55  }
  0x4c   :  { %834 = vperm.xlu2 %1265, %v509_v13  }
  0x4d   :  { %800 = vperm.xlu0 %1263, %v507_v62  }
  0x4e   :  { %854 = vperm.xlu1 %1264, %v513_v2  }
  0x53   :  { %407 = vmatmul.bf16.gmra.mxu0 %v1047_v15 }
  0x54   :  { %436 = vmatmul.bf16.gmra.mxu1 %v1051_v16  ;;  %790 = vperm.xlu2 %1265, %v505_v23  }
  0x55   :  { %465 = vmatmul.bf16.gmra.mxu2 %v1055_v17  ;;  %864 = vperm.xlu0 %1263, %v515_v4  }
  0x56   :  { %494 = vmatmul.bf16.gmra.mxu3 %v1059_v18  ;;  %951 = vperm.xlu1 %1264, %v948_v11  }
  0xa0   :  { %v393_v21 = vpop.f32.mrf.mxu0  ;;  %v1700_v4 = vpop.permute.xlu1 %775 }
  0xa1   :  { %v422_v22 = vpop.f32.mrf.mxu1 }
  0xa2   :  { %v423_v25 = vadd.f32 %v422_v22, %v393_v21 }
  0xa8   :  { %v451_v27 = vpop.f32.mrf.mxu2  ;;  %v395_v30 = vpop.f32.mrf.mxu0 }
  0xa9   :  { %v480_v28 = vpop.f32.mrf.mxu3  ;;  %v452_v29 = vadd.f32 %v451_v27, %v423_v25  ;;  %v424_v31 = vpop.f32.mrf.mxu1 }
  0xaa   :  { %v425_v36 = vadd.f32 %v424_v31, %v395_v30  ;;  %v512_v31 = vld [vmem:[%s1861_s3 + $0x20] sm:$0xff] }
  0xab   :  { %v1571_v33 = vadd.f32 %v480_v28, %v452_v29  ;;  %849 = vperm.xlu2 %1265, %v512_v31  }
  0xad   :  { %v586_v34 = vmul.f32 %v1571_v33, %v1571_v33  ;;  %1188 = vmatmul.msk.f32.vlgmr.msrb.gmra.mxu0 %vm520_vm0, %v1571_v33 }
  0xaf   :  { %1196 = vmatmul.msk.f32.vlgmr.msrb.gmra.mxu1 %vm520_vm0, %v586_v34 }
  0xb0   :  { %v453_v37 = vpop.f32.mrf.mxu2  ;;  %v398_v40 = vpop.f32.mrf.mxu0 }
  0xb1   :  { %v482_v38 = vpop.f32.mrf.mxu3  ;;  %v454_v39 = vadd.f32 %v453_v37, %v425_v36  ;;  %v427_v41 = vpop.f32.mrf.mxu1 }
  0xb2   :  { %v428_v44 = vadd.f32 %v427_v41, %v398_v40 }
  0xb3   :  { %v1584_v43 = vadd.f32 %v482_v38, %v454_v39  ;;  %v514_v39 = vld [vmem:[%s1861_s3 + $0x30] sm:$0xff] }
  0xb4   :  { %859 = vperm.xlu2 %1265, %v514_v39  }
  0xb5   :  { %1189 = vmatmul.msk.f32.gmra.mxu0 %vm520_vm0, %v1584_v43  ;;  %v587_v45 = vmul.f32 %v1584_v43, %v1584_v43 }
  0xb7   :  { %1197 = vmatmul.msk.f32.gmra.mxu1 %vm520_vm0, %v587_v45 }
  0xb8   :  { %v456_v47 = vpop.f32.mrf.mxu2  ;;  %v400_v50 = vpop.f32.mrf.mxu0 }
  0xb9   :  { %v485_v48 = vpop.f32.mrf.mxu3  ;;  %v457_v49 = vadd.f32 %v456_v47, %v428_v44  ;;  %v429_v51 = vpop.f32.mrf.mxu1 }
  0xba   :  { %v430_v56 = vadd.f32 %v429_v51, %v400_v50 }
  0xbb   :  { %v1597_v53 = vadd.f32 %v485_v48, %v457_v49 }
  0xbd   :  { %1190 = vmatmul.msk.f32.gmra.mxu0 %vm520_vm0, %v1597_v53  ;;  %v588_v54 = vmul.f32 %v1597_v53, %v1597_v53 }
  0xbf   :  { %1198 = vmatmul.msk.f32.gmra.mxu1 %vm520_vm0, %v588_v54 }
  0xc0   :  { %v458_v57 = vpop.f32.mrf.mxu2  ;;  %v403_v60 = vpop.f32.mrf.mxu0 }
  0xc1   :  { %v487_v58 = vpop.f32.mrf.mxu3  ;;  %v459_v59 = vadd.f32 %v458_v57, %v430_v56  ;;  %v432_v61 = vpop.f32.mrf.mxu1 }
  0xc2   :  { %v433_v0 = vadd.f32 %v432_v61, %v403_v60 }
  0xc3   :  { %v1610_v63 = vadd.f32 %v487_v58, %v459_v59 }
  0xc5   :  { %1191 = vmatmul.msk.f32.gmra.mxu0 %vm520_vm0, %v1610_v63  ;;  %v589_v1 = vmul.f32 %v1610_v63, %v1610_v63 }
  0xc7   :  { %1199 = vmatmul.msk.f32.gmra.mxu1 %vm520_vm0, %v589_v1 }
  0xc8   :  { %v461_v5 = vpop.f32.mrf.mxu2  ;;  %v405_v8 = vpop.f32.mrf.mxu0 }
  0xc9   :  { %v490_v6 = vpop.f32.mrf.mxu3  ;;  %v462_v7 = vadd.f32 %v461_v5, %v433_v0  ;;  %v434_v9 = vpop.f32.mrf.mxu1 }
  0xca   :  { %v435_v14 = vadd.f32 %v434_v9, %v405_v8 }
  0xcb   :  { %v1626_v10 = vadd.f32 %v490_v6, %v462_v7 }
  0xcd   :  { %1192 = vmatmul.msk.f32.gmra.mxu0 %vm520_vm0, %v1626_v10  ;;  %v590_v12 = vmul.f32 %v1626_v10, %v1626_v10 }
  0xcf   :  { %1200 = vmatmul.msk.f32.gmra.mxu1 %vm520_vm0, %v590_v12 }
  0xd0   :  { %v463_v15 = vpop.f32.mrf.mxu2  ;;  %v408_v18 = vpop.f32.mrf.mxu0 }
  0xd1   :  { %v492_v16 = vpop.f32.mrf.mxu3  ;;  %v464_v17 = vadd.f32 %v463_v15, %v435_v14  ;;  %v437_v19 = vpop.f32.mrf.mxu1 }
  0xd2   :  { %v438_v22 = vadd.f32 %v437_v19, %v408_v18  ;;  %v766_v14 = vpop.permute.xlu0 %765  ;;  %v1718_v19 = vpop.permute.xlu2 %829 }
  0xd3   :  { %v1636_v20 = vadd.f32 %v492_v16, %v464_v17 }
  0xd5   :  { %v591_v21 = vmul.f32 %v1636_v20, %v1636_v20  ;;  %1193 = vmatmul.msk.f32.vlgmr.msrb.gmra.mxu3 %vm520_vm0, %v1636_v20 }
  0xd7   :  { %1201 = vmatmul.msk.f32.vlgmr.msrb.gmra.mxu2 %vm520_vm0, %v591_v21 }
  0xd8   :  { %v466_v24 = vpop.f32.mrf.mxu2  ;;  %v410_v28 = vpop.f32.mrf.mxu0 }
  0xd9   :  { %v495_v25 = vpop.f32.mrf.mxu3  ;;  %v467_v26 = vadd.f32 %v466_v24, %v438_v22  ;;  %v439_v29 = vpop.f32.mrf.mxu1 }
  0xda   :  { %v440_v32 = vadd.f32 %v439_v29, %v410_v28  ;;  %v1720_v22 = vpop.permute.xlu1 %780  ;;  %v771_v39 = vpop.permute.xlu0 %770 }
  0xdb   :  { %v1646_v27 = vadd.f32 %v495_v25, %v467_v26 }
  0xdd   :  { %1194 = vmatmul.msk.f32.gmra.mxu3 %vm520_vm0, %v1646_v27  ;;  %v592_v30 = vmul.f32 %v1646_v27, %v1646_v27 }
  0xdf   :  { %1202 = vmatmul.msk.f32.gmra.mxu2 %vm520_vm0, %v592_v30 }
  0xe0   :  { %v468_v34 = vpop.f32.mrf.mxu2 }
  0xe1   :  { %v469_v35 = vadd.f32 %v468_v34, %v440_v32  ;;  %v497_v36 = vpop.f32.mrf.mxu3 }
  0xe3   :  { %v1656_v37 = vadd.f32 %v497_v36, %v469_v35 }
  0xe5   :  { %1195 = vmatmul.msk.f32.gmra.mxu3 %vm520_vm0, %v1656_v37  ;;  %v593_v38 = vmul.f32 %v1656_v37, %v1656_v37 }
  0xe7   :  { %1203 = vmatmul.msk.f32.gmra.mxu2 %vm520_vm0, %v593_v38 }
 0x12a   :  { %v1666_v40 = vpop.f32.mrf.mxu0 }
 0x12b   :  { %v659_v45 = vmul.f32 %v1666_v40, %v1666_v40 }
 0x12c   :  { %v635_v41 = vpop.f32.mrf.mxu1 }
 0x12d   :  { %v667_v48 = vsub.f32 %v635_v41, %v659_v45 }
 0x12f   :  { %v675_v52 = vadd.f32 1e-05, %v667_v48 }
 0x131   :  { %1266 = vrsqrt.f32 %v675_v52  ;;  %vm689_vm2 = vweird.f32 %v675_v52 }
 0x132   :  { %v1668_v42 = vpop.f32.mrf.mxu0 }
 0x133   :  { %v660_v46 = vmul.f32 %v1668_v42, %v1668_v42 }
 0x134   :  { %v638_v44 = vpop.f32.mrf.mxu1 }
 0x135   :  { %v668_v51 = vsub.f32 %v638_v44, %v660_v46 }
 0x137   :  { %v1678_v55 = vadd.f32 1e-05, %v668_v51  ;;  %v1690_v62 = vpop.eup %1266 }
 0x138   :  { %v684_v3 = vmul.f32 %v1690_v62, %v675_v52  ;;  %vm690_vm1 = vweird.f32 %v1690_v62  ;;  %v1750_v52 = vpop.permute.xlu1 %839 }
 0x139   :  { %1268 = vrsqrt.f32 %v1678_v55  ;;  %vm1740_vm4 = vmor %vm689_vm2, %vm690_vm1  ;;  %vm699_vm5 = vweird.f32 %v1678_v55 }
 0x13a   :  { %v1674_v47 = vpop.f32.mrf.mxu0  ;;  %v685_v12 = vmul.f32 %v1690_v62, %v684_v3 }
 0x13b   :  { %v661_v49 = vmul.f32 %v1674_v47, %v1674_v47 }
 0x13c   :  { %v641_v50 = vpop.f32.mrf.mxu1  ;;  %v686_v17 = vmul.f32 0.5, %v685_v12 }
 0x13d   :  { %v669_v54 = vsub.f32 %v641_v50, %v661_v49  ;;  %v1738_v49 = vpop.permute.xlu2 %834 }
 0x13e   :  { %v687_v25 = vsub.f32 1.5, %v686_v17 }
 0x13f   :  { %v1682_v57 = vadd.f32 1e-05, %v669_v54  ;;  %v1695_v1 = vpop.eup %1268 }
 0x140   :  { %v694_v8 = vmul.f32 %v1695_v1, %v1678_v55  ;;  %v688_v38 = vmul.f32 %v1690_v62, %v687_v25  ;;  %vm700_vm3 = vweird.f32 %v1695_v1  ;;  %v1780_v25 = vpop.permute.xlu1 %795 }
 0x141   :  { %1270 = vrsqrt.f32 %v1682_v57  ;;  %vm701_vm7 = vmor %vm699_vm5, %vm700_vm3  ;;  %vm709_vm8 = vweird.f32 %v1682_v57 }
 0x142   :  { %v1680_v56 = vpop.f32.mrf.mxu0  ;;  %v695_v15 = vmul.f32 %v1695_v1, %v694_v8  ;;  %v692_v51 = vsel %vm1740_vm4, %v1690_v62, %v688_v38 }
 0x143   :  { %v662_v58 = vmul.f32 %v1680_v56, %v1680_v56  ;;  %v803_v3 = vmul.f32 %v766_v14, %v692_v51 }
 0x144   :  { %v644_v59 = vpop.f32.mrf.mxu1  ;;  %v696_v21 = vmul.f32 0.5, %v695_v15 }
 0x145   :  { %v670_v60 = vsub.f32 %v644_v59, %v662_v58 }
 0x146   :  { %v697_v31 = vsub.f32 1.5, %v696_v21 }
 0x147   :  { %v1688_v61 = vadd.f32 1e-05, %v670_v60  ;;  %v1702_v6 = vpop.eup %1270 }
 0x148   :  { %v704_v13 = vmul.f32 %v1702_v6, %v1682_v57  ;;  %v698_v46 = vmul.f32 %v1695_v1, %v697_v31  ;;  %vm710_vm6 = vweird.f32 %v1702_v6 }
 0x149   :  { %1272 = vrsqrt.f32 %v1688_v61  ;;  %vm711_vm10 = vmor %vm709_vm8, %vm710_vm6  ;;  %vm719_vm11 = vweird.f32 %v1688_v61 }
 0x14a   :  { %v1693_v0 = vpop.f32.mrf.mxu0  ;;  %v705_v18 = vmul.f32 %v1702_v6, %v704_v13  ;;  %v702_v55 = vsel %vm701_vm7, %v1695_v1, %v698_v46  ;;  %v786_v13 = vpop.permute.xlu0 %785 }
 0x14b   :  { %v663_v2 = vmul.f32 %v1693_v0, %v1693_v0  ;;  %v804_v1 = vmul.f32 %v771_v39, %v702_v55  ;;  %v945_v39 = vld [vmem:[%s1863_s5 + $0x8] sm:$0xff] }
 0x14c   :  { %v647_v5 = vpop.f32.mrf.mxu1  ;;  %v706_v26 = vmul.f32 0.5, %v705_v18 }
 0x14d   :  { %v671_v7 = vsub.f32 %v647_v5, %v663_v2 }
 0x14e   :  { %v707_v41 = vsub.f32 1.5, %v706_v26 }
 0x14f   :  { %v1706_v9 = vpop.eup %1272  ;;  %v1708_v11 = vadd.f32 1e-05, %v671_v7 }
 0x150   :  { %v714_v16 = vmul.f32 %v1706_v9, %v1688_v61  ;;  %v708_v54 = vmul.f32 %v1702_v6, %v707_v41  ;;  %vm720_vm9 = vweird.f32 %v1706_v9  ;;  %v812_v41 = vmul.f32 %v804_v1, %v1584_v43 }
 0x151   :  { %1274 = vrsqrt.f32 %v1708_v11  ;;  %vm721_vm13 = vmor %vm719_vm11, %vm720_vm9  ;;  %vm729_vm14 = vweird.f32 %v1708_v11 }
 0x152   :  { %v715_v23 = vmul.f32 %v1706_v9, %v714_v16  ;;  %v712_v7 = vsel %vm711_vm10, %v1702_v6, %v708_v54  ;;  %v819_v6 = vmul.f32 %v803_v3, %v1666_v40  ;;  %v791_v16 = vpop.permute.xlu2 %790  ;;  %v845_v46 = vpop.permute.xlu0 %844 }
 0x153   :  { %v805_v61 = vmul.f32 %v1700_v4, %v712_v7 }
 0x154   :  { %v716_v32 = vmul.f32 0.5, %v715_v23  ;;  %v820_v23 = vmul.f32 %v804_v1, %v1668_v42  ;;  %v947_v42 = vld [vmem:[%s1863_s5 + $0x18] sm:$0xff] }
 0x155   :  { %970 = vmatpush.msra.mxu2 %v947_v42  ;;  %v813_v50 = vmul.f32 %v805_v61, %v1597_v53 }
 0x156   :  { %v717_v48 = vsub.f32 1.5, %v716_v32 }
 0x157   :  { %v1723_v24 = vpop.eup %1274 }
 0x158   :  { %v724_v28 = vmul.f32 %v1723_v24, %v1708_v11  ;;  %v1727_v29 = vpop.f32.mrf.mxu3  ;;  %v718_v62 = vmul.f32 %v1706_v9, %v717_v48  ;;  %vm730_vm12 = vweird.f32 %v1723_v24 }
 0x159   :  { %v664_v30 = vmul.f32 %v1727_v29, %v1727_v29  ;;  %vm731_vm15 = vmor %vm729_vm14, %vm730_vm12 }
 0x15a   :  { %v725_v34 = vmul.f32 %v1723_v24, %v724_v28  ;;  %v650_v35 = vpop.f32.mrf.mxu2  ;;  %v722_v15 = vsel %vm721_vm13, %v1706_v9, %v718_v62  ;;  %v821_v28 = vmul.f32 %v805_v61, %v1674_v47  ;;  %v907_v61 = vld [vmem:[%s1864_s6] sm:$0xff] }
 0x15b   :  { %v672_v36 = vsub.f32 %v650_v35, %v664_v30  ;;  %v806_v9 = vmul.f32 %v1720_v22, %v722_v15  ;;  %v946_v22 = vld [vmem:[%s1863_s5 + $0x10] sm:$0xff] }
 0x15c   :  { %v726_v44 = vmul.f32 0.5, %v725_v34  ;;  %v868_v34 = vsub.f32 %v1738_v49, %v820_v23  ;;  %971 = vmatpush.msra.mxu2 %v946_v22  ;;  %v944_v49 = vld [vmem:[%s1863_s5] sm:$0xff] }
 0x15d   :  { %v1734_v45 = vadd.f32 1e-05, %v672_v36  ;;  %v822_v35 = vmul.f32 %v806_v9, %v1680_v56 }
 0x15e   :  { %v727_v58 = vsub.f32 1.5, %v726_v44  ;;  %v869_v44 = vsub.f32 %v1750_v52, %v821_v28  ;;  %v876_v43 = vadd.f32 %v868_v34, %v812_v41  ;;  %972 = vmatpush.msra.mxu2 %v945_v39 }
 0x15f   :  { %1276 = vrsqrt.f32 %v1734_v45  ;;  %vm739_vm2 = vweird.f32 %v1734_v45  ;;  %v870_v51 = vsub.f32 %v845_v46, %v822_v35 }
 0x160   :  { %v1753_v59 = vpop.f32.mrf.mxu3  ;;  %v728_v8 = vmul.f32 %v1723_v24, %v727_v58  ;;  %v877_v58 = vadd.f32 %v869_v44, %v813_v50  ;;  %973 = vmatpush.msra.mxu2 %v944_v49  ;;  %v892_v53 = vmul.f32 0.2, %v876_v43  ;;  %vm884_vm6 = vcmp.gt.f32.partialorder %v876_v43, 0.0 }
 0x161   :  { %v665_v60 = vmul.f32 %v1753_v59, %v1753_v59 }
 0x162   :  { %v653_v2 = vpop.f32.mrf.mxu2  ;;  %v732_v17 = vsel %vm731_vm15, %v1723_v24, %v728_v8  ;;  %v867_v24 = vsub.f32 %v1718_v19, %v819_v6  ;;  %v811_v19 = vmul.f32 %v803_v3, %v1571_v33  ;;  %v855_v3 = vpop.permute.xlu1 %854  ;;  %v893_v15 = vmul.f32 0.2, %v877_v58 }
 0x163   :  { %v673_v5 = vsub.f32 %v653_v2, %v665_v60  ;;  %v807_v40 = vmul.f32 %v786_v13, %v732_v17  ;;  %v814_v60 = vmul.f32 %v806_v9, %v1610_v63  ;;  %vm885_vm9 = vcmp.gt.f32.partialorder %v877_v58, 0.0 }
 0x164   :  { %v875_v33 = vadd.f32 %v867_v24, %v811_v19  ;;  %v900_v17 = vsel %vm884_vm6, %v876_v43, %v892_v53  ;;  %v901_v28 = vsel %vm885_vm9, %v877_v58, %v893_v15 }
 0x165   :  { %v1277_v12 = vpop.eup %1276  ;;  %v1765_v57 = vadd.f32 1e-05, %v673_v5  ;;  %v823_v56 = vmul.f32 %v807_v40, %v1693_v0  ;;  %v850_v0 = vpop.permute.xlu2 %849  ;;  %v878_v8 = vadd.f32 %v870_v51, %v814_v60  ;;  %v913_v51 = vld [vmem:[%s1864_s6 + $0x30] sm:$0xff] }
 0x166   :  { %v734_v14 = vmul.f32 %v1277_v12, %v1734_v45  ;;  %vm740_vm1 = vweird.f32 %v1277_v12  ;;  %vm883_vm4 = vcmp.gt.f32.partialorder %v875_v33, 0.0  ;;  %v891_v2 = vmul.f32 0.2, %v875_v33 }
 0x167   :  { %1278 = vrsqrt.f32 %v1765_v57  ;;  %vm741_vm3 = vmor %vm739_vm2, %vm740_vm1  ;;  %v871_v55 = vsub.f32 %v850_v0, %v823_v56  ;;  %vm749_vm7 = vweird.f32 %v1765_v57  ;;  %vm886_vm10 = vcmp.gt.f32.partialorder %v878_v8, 0.0 }
 0x168   :  { %v735_v18 = vmul.f32 %v1277_v12, %v734_v14  ;;  %v1774_v21 = vpop.f32.mrf.mxu3  ;;  %v899_v6 = vsel %vm883_vm4, %v875_v33, %v891_v2 }
 0x169   :  { %v666_v11 = vmul.f32 %v1774_v21, %v1774_v21 }
 0x16a   :  { %v736_v4 = vmul.f32 0.5, %v735_v18  ;;  %v656_v26 = vpop.f32.mrf.mxu2  ;;  %v894_v18 = vmul.f32 0.2, %v878_v8 }
 0x16b   :  { %v674_v30 = vsub.f32 %v656_v26, %v666_v11  ;;  %v909_v26 = vld [vmem:[%s1864_s6 + $0x10] sm:$0xff] }
 0x16c   :  { %v737_v31 = vsub.f32 1.5, %v736_v4  ;;  %v915_v4 = vmul.f32 %v907_v61, %v899_v6  ;;  %v902_v22 = vsel %vm886_vm10, %v878_v8, %v894_v18  ;;  %v917_v19 = vmul.f32 %v909_v26, %v901_v28  ;;  %v952_v18 = vpop.permute.xlu1 %951 }
 0x16d   :  { %v1279_v32 = vpop.eup %1278  ;;  %v1792_v47 = vadd.f32 1e-05, %v674_v30 }
 0x16e   :  { %v738_v36 = vmul.f32 %v1277_v12, %v737_v31  ;;  %v744_v38 = vmul.f32 %v1279_v32, %v1765_v57  ;;  %vm750_vm5 = vweird.f32 %v1279_v32  ;;  %v908_v57 = vld [vmem:[%s1864_s6 + $0x8] sm:$0xff]  ;;  %v860_v31 = vpop.permute.xlu2 %859 }
 0x16f   :  { %1280 = vrsqrt.f32 %v1792_v47  ;;  %vm751_vm8 = vmor %vm749_vm7, %vm750_vm5  ;;  %v916_v24 = vmul.f32 %v908_v57, %v900_v17  ;;  %vm759_vm14 = vweird.f32 %v1792_v47 }
 0x170   :  { %v742_v45 = vsel %vm741_vm3, %v1277_v12, %v738_v36  ;;  %v745_v48 = vmul.f32 %v1279_v32, %v744_v38  ;;  %v815_v12 = vmul.f32 %v807_v40, %v1626_v10  ;;  %vm978_vm3 = vcmask 8192  }
 0x171   :  { %v808_v52 = vmul.f32 %v791_v16, %v742_v45  ;;  %v924_v41 = vsel %vm520_vm0, %v916_v24, 0.0 }
 0x172   :  { %v746_v54 = vmul.f32 0.5, %v745_v48  ;;  %v926_v48 = vsel %vm520_vm0, %v917_v19, 0.0 }
 0x173   :  { %v824_v62 = vmul.f32 %v808_v52, %v1727_v29  ;;  %v879_v29 = vadd.f32 %v871_v55, %v815_v12  ;;  %v816_v14 = vmul.f32 %v808_v52, %v1636_v20  ;;  %v801_v20 = vpop.permute.xlu0 %800 }
 0x174   :  { %v747_v5 = vsub.f32 1.5, %v746_v54 }
 0x175   :  { %v1281_v7 = vpop.eup %1280  ;;  %v872_v1 = vsub.f32 %v855_v3, %v824_v62  ;;  %v895_v40 = vmul.f32 0.2, %v879_v29  ;;  %vm887_vm11 = vcmp.gt.f32.partialorder %v879_v29, 0.0 }
 0x176   :  { %v748_v13 = vmul.f32 %v1279_v32, %v747_v5  ;;  %v754_v63 = vmul.f32 %v1281_v7, %v1792_v47  ;;  %vm760_vm12 = vweird.f32 %v1281_v7  ;;  %v923_v47 = vsel %vm520_vm0, %v915_v4, 0.0 }
 0x177   :  { %v880_v23 = vadd.f32 %v872_v1, %v816_v14  ;;  %v903_v38 = vsel %vm887_vm11, %v879_v29, %v895_v40  ;;  %vm761_vm15 = vmor %vm759_vm14, %vm760_vm12  ;;  %v925_v50 = vadd.f32 %v924_v41, %v923_v47 }
 0x178   :  { %v752_v10 = vsel %vm751_vm8, %v1279_v32, %v748_v13  ;;  %v755_v16 = vmul.f32 %v1281_v7, %v754_v63 }
 0x179   :  { %v809_v9 = vmul.f32 %v1780_v25, %v752_v10  ;;  %v910_v25 = vld [vmem:[%s1864_s6 + $0x18] sm:$0xff]  ;;  %v896_v32 = vmul.f32 0.2, %v880_v23  ;;  %vm888_vm13 = vcmp.gt.f32.partialorder %v880_v23, 0.0  ;;  %v927_v60 = vadd.f32 %v926_v48, %v925_v50 }
 0x17a   :  { %v756_v11 = vmul.f32 0.5, %v755_v16  ;;  %v918_v44 = vmul.f32 %v910_v25, %v902_v22 }
 0x17b   :  { %v825_v30 = vmul.f32 %v809_v9, %v1753_v59  ;;  %v817_v34 = vmul.f32 %v809_v9, %v1646_v27  ;;  %v911_v59 = vld [vmem:[%s1864_s6 + $0x20] sm:$0xff]  ;;  %v904_v33 = vsel %vm888_vm13, %v880_v23, %v896_v32  ;;  %v912_v27 = vld [vmem:[%s1864_s6 + $0x28] sm:$0xff]  ;;  %v865_v58 = vpop.permute.xlu0 %864  ;;  %v954_v23 = vperm.slane %v952_v18, 0 }
 0x17c   :  { %v757_v42 = vsub.f32 1.5, %v756_v11  ;;  %v919_v49 = vmul.f32 %v911_v59, %v903_v38  ;;  %v928_v0 = vsel %vm520_vm0, %v918_v44, 0.0  ;;  %v920_v54 = vmul.f32 %v912_v27, %v904_v33 }
 0x17d   :  { %v873_v35 = vsub.f32 %v860_v31, %v825_v30  ;;  %v929_v5 = vadd.f32 %v928_v0, %v927_v60 }
 0x17e   :  { %v758_v36 = vmul.f32 %v1281_v7, %v757_v42  ;;  %v930_v2 = vsel %vm520_vm0, %v919_v49, 0.0  ;;  %v932_v53 = vsel %vm520_vm0, %v920_v54, 0.0 }
 0x17f   :  { %v881_v39 = vadd.f32 %v873_v35, %v817_v34  ;;  %v931_v8 = vadd.f32 %v930_v2, %v929_v5 }
 0x180   :  { %v762_v56 = vsel %vm761_vm15, %v1281_v7, %v758_v36 }
 0x181   :  { %vm889_vm1 = vcmp.gt.f32.partialorder %v881_v39, 0.0  ;;  %v897_v46 = vmul.f32 0.2, %v881_v39  ;;  %v810_v45 = vmul.f32 %v801_v20, %v762_v56  ;;  %v933_v63 = vadd.f32 %v932_v53, %v931_v8 }
 0x183   :  { %v905_v43 = vsel %vm889_vm1, %v881_v39, %v897_v46  ;;  %v826_v52 = vmul.f32 %v810_v45, %v1774_v21  ;;  %v818_v55 = vmul.f32 %v810_v45, %v1656_v37  ;;  %v914_v21 = vld [vmem:[%s1864_s6 + $0x38] sm:$0xff]  ;;  %s985_s6 = sshll.u32 %s1309_s24, 4  ;;  %s986_s6 = int_to_ptr.vmem [resolvable:$true] %s985_s6 }
 0x184   :  { %v921_v3 = vmul.f32 %v913_v51, %v905_v43 }
 0x185   :  { %v874_v62 = vsub.f32 %v865_v58, %v826_v52 }
 0x186   :  { %v934_v1 = vsel %vm520_vm0, %v921_v3, 0.0 }
 0x187   :  { %v882_v7 = vadd.f32 %v874_v62, %v818_v55  ;;  %v935_v15 = vadd.f32 %v934_v1, %v933_v63 }
 0x189   :  { %vm890_vm2 = vcmp.gt.f32.partialorder %v882_v7, 0.0  ;;  %v898_v12 = vmul.f32 0.2, %v882_v7 }
 0x18b   :  { %v906_v13 = vsel %vm890_vm2, %v882_v7, %v898_v12 }
 0x18c   :  { %v922_v37 = vmul.f32 %v914_v21, %v906_v13 }
 0x18e   :  { %v936_v29 = vsel %vm520_vm0, %v922_v37, 0.0 }
 0x18f   :  { %v937_v14 = vadd.f32 %v936_v29, %v935_v15 }
 0x191   :  { %v938_v61 = vrot.slane %v937_v14, 4 }
 0x193   :  { %v939_v6 = vadd.f32 %v938_v61, %v937_v14 }
 0x195   :  { %v940_v10 = vrot.slane %v939_v6, 2 }
 0x197   :  { %v941_v16 = vadd.f32 %v940_v10, %v939_v6 }
 0x199   :  { %v942_v57 = vrot.slane %v941_v16, 1 }
 0x19b   :  { %v943_v17 = vadd.f32 %v942_v57, %v941_v16 }
 0x19d   :  { %1204 = vmatmul.msk.f32.vlgmr.msra.gmra.mxu2 %vm520_vm0, %v943_v17 }
 0x220   :  { %v975_v9 = vpop.f32.mrf.mxu2 }
 0x221   :  { %v976_v20 = vadd.f32 %v975_v9, %v954_v23 }
 0x223   :  { %979 = vst.msk [vmem:[#allocation3] sm:$0x1] %vm978_vm3, %v976_v20 }
 0x224   :  { %990 = dma.vmem_to_hbm [thread:$0]  %s986_s6, 16, %s988_s2, [#allocation4]  }
 0x225   :  { %1306 = dma.done.wait [#allocation4], 16  }
 0x226   :  { %1307 = vsyncadd [#allocation4], 4294967280 }
 0x227   :  { %995 = vsyncpa [#allocation4], 1 }

</bundles_post_ra>
